<compile_context>
chip_gen: v7x
topology: tpu7x:2x2x1
jax: 0.10.0
libtpu: 0.0.40
codegen_flags: <defaults>
</compile_context>

<pallas_src>
import functools
import math

import jax
import jax.numpy as jnp
from jax.experimental import pallas as pl
from jax.experimental.pallas import tpu as pltpu


# --------------------------------------------------------------------------
# Kernels
# --------------------------------------------------------------------------
def _qkv_projection_kernel(x_ref, wq_ref, wk_ref, wv_ref,
                           bq_ref, bk_ref, bv_ref,
                           q_ref, k_ref, v_ref, *, scale):
    """One grid step = (batch b, row tile i): q/k/v projections for that tile.

    x/weights are compute_dtype (bf16); accumulation is f32; biases are f32;
    results are stored in compute_dtype (q pre-scaled by 1/sqrt(D))."""
    x = x_ref[...]

    def proj(w_ref, b_ref):
        acc = jax.lax.dot_general(x, w_ref[...], (((1,), (0,)), ((), ())),
                                  preferred_element_type=jnp.float32)
        return acc + b_ref[...]

    q_ref[...] = (proj(wq_ref, bq_ref) * scale).astype(q_ref.dtype)
    k_ref[...] = proj(wk_ref, bk_ref).astype(k_ref.dtype)
    v_ref[...] = proj(wv_ref, bv_ref).astype(v_ref.dtype)


def _flash_attention_kernel(q_ref, k_ref, v_ref, wo_ref, bo_ref, o_ref,
                            m_scr, l_scr, acc_scr, *, compute_dtype):
    """One grid step = (batch b, query tile i, key tile kv): online softmax.

    q/k/v arrive already projected in compute_dtype; softmax statistics and
    the context accumulator stay in f32; the output projection runs once per
    query tile in the finalize branch."""
    kv = pl.program_id(2)

    @pl.when(kv == 0)
    def _init():
        m_scr[...] = jnp.full_like(m_scr, -jnp.inf)
        l_scr[...] = jnp.zeros_like(l_scr)
        acc_scr[...] = jnp.zeros_like(acc_scr)

    # scores: contract last dim of q with last dim of k (no explicit k.T).
    s = jax.lax.dot_general(q_ref[...], k_ref[...], (((1,), (1,)), ((), ())),
                            preferred_element_type=jnp.float32)  # (TQ, TK) f32

    m_prev = m_scr[...]
    m_new = jnp.maximum(m_prev, jnp.max(s, axis=-1, keepdims=True))
    alpha = jnp.exp(m_prev - m_new)
    p = jnp.exp(s - m_new)
    l_scr[...] = alpha * l_scr[...] + jnp.sum(p, axis=-1, keepdims=True)
    pv = jax.lax.dot_general(p.astype(compute_dtype), v_ref[...],
                             (((1,), (0,)), ((), ())),
                             preferred_element_type=jnp.float32)  # (TQ, D) f32
    acc_scr[...] = alpha * acc_scr[...] + pv
    m_scr[...] = m_new

    @pl.when(kv == pl.num_programs(2) - 1)
    def _finalize():
        ctx = acc_scr[...] * pl.reciprocal(l_scr[...], approx=True)
        out = jax.lax.dot_general(ctx.astype(compute_dtype), wo_ref[...],
                                  (((1,), (0,)), ((), ())),
                                  preferred_element_type=jnp.float32)
        o_ref[...] = (out + bo_ref[...]).astype(o_ref.dtype)


# --------------------------------------------------------------------------
# Helpers
# --------------------------------------------------------------------------
def _pick_tile(s, preferred, multiple=8):
    """Largest divisor of s that is <= preferred, preferring multiples of
    `multiple`; falls back to the largest plain divisor <= preferred."""
    if s <= preferred:
        return s
    best = None
    for t in range(preferred, 0, -1):
        if s % t == 0:
            if t % multiple == 0:
                return t
            if best is None:
                best = t
    return best if best is not None else s


def _vmem_limit_bytes(est_bytes):
    """2x analytic estimate, floored at 16 MiB, capped at 75% of chip VMEM."""
    try:
        cap = int(pltpu.get_tpu_info().vmem_capacity_bytes * 3 // 4)
    except Exception:  # pragma: no cover - info query not available
        cap = 48 * 1024 * 1024
    return int(min(max(2 * est_bytes, 16 * 1024 * 1024), cap))


# --------------------------------------------------------------------------
# Wrapper
# --------------------------------------------------------------------------
def attention_layer(x, wq, wk, wv, wo, bq, bk, bv, bo, *,
                    tq=None, tk=None, tm=None,
                    compute_dtype=jnp.bfloat16,
                    kv_buffers=3,
                    use_custom_buffering=True):
    """x: (B, S, D). Weights: (D, D). Biases: (1, D). Returns (B, S, D)."""
    B, S, D = x.shape
    out_dtype = x.dtype
    scale = 1.0 / math.sqrt(D)

    # ---- lane-dense padding of the feature dim (exact: zero columns) -------
    Dp = ((D + 127) // 128) * 128
    Dp = max(Dp, 128)

    def pad_d(a, axes):
        if Dp == D:
            return a
        pads = [(0, 0)] * a.ndim
        for ax in axes:
            pads[ax] = (0, Dp - a.shape[ax])
        return jnp.pad(a, pads)

    xc = pad_d(x, (2,)).astype(compute_dtype)
    wqc = pad_d(wq, (0, 1)).astype(compute_dtype)
    wkc = pad_d(wk, (0, 1)).astype(compute_dtype)
    wvc = pad_d(wv, (0, 1)).astype(compute_dtype)
    woc = pad_d(wo, (0, 1)).astype(compute_dtype)
    bqc = pad_d(bq, (1,)).astype(jnp.float32)
    bkc = pad_d(bk, (1,)).astype(jnp.float32)
    bvc = pad_d(bv, (1,)).astype(jnp.float32)
    boc = pad_d(bo, (1,)).astype(jnp.float32)

    # ---- tiles --------------------------------------------------------------
    tm = tm if tm is not None else _pick_tile(S, 512)
    tq = tq if tq is not None else _pick_tile(S, 512)
    tk = tk if tk is not None else _pick_tile(S, 512)
    assert S % tm == 0 and S % tq == 0 and S % tk == 0, (S, tm, tq, tk)
    kv_steps = S // tk

    const_kw = dict(pipeline_mode=pl.Buffered(1)) if use_custom_buffering else {}
    kv_kw = (dict(pipeline_mode=pl.Buffered(min(kv_buffers, kv_steps)))
             if (use_custom_buffering and kv_steps > 2) else {})

    bf16 = 2
    f32 = 4

    # ---- pass 1: q/k/v projections (hoisted out of the kv loop) ------------
    w_spec = pl.BlockSpec((Dp, Dp), lambda b, i: (0, 0), **const_kw)
    bias_spec = pl.BlockSpec((1, Dp), lambda b, i: (0, 0), **const_kw)
    x_spec = pl.BlockSpec((pl.Squeezed(), tm, Dp), lambda b, i: (b, i, 0))
    qkv_spec = pl.BlockSpec((pl.Squeezed(), tm, Dp), lambda b, i: (b, i, 0))

    proj_est = (2 * tm * Dp * bf16                 # x, double-buffered
                + 3 * Dp * Dp * bf16 + 3 * Dp * f32  # weights + biases (single)
                + 3 * 2 * tm * Dp * bf16           # q/k/v outputs, double-buffered
                + 4 * tm * Dp * f32)               # temporaries

    q, k, v = pl.pallas_call(
        functools.partial(_qkv_projection_kernel, scale=scale),
        out_shape=tuple(jax.ShapeDtypeStruct((B, S, Dp), compute_dtype)
                        for _ in range(3)),
        grid_spec=pltpu.PrefetchScalarGridSpec(
            num_scalar_prefetch=0,
            grid=(B, S // tm),
            in_specs=[x_spec, w_spec, w_spec, w_spec,
                      bias_spec, bias_spec, bias_spec],
            out_specs=(qkv_spec, qkv_spec, qkv_spec)),
        compiler_params=pltpu.CompilerParams(
            dimension_semantics=("parallel", "parallel"),
            vmem_limit_bytes=_vmem_limit_bytes(proj_est)),
    )(xc, wqc, wkc, wvc, bqc, bkc, bvc)

    # ---- pass 2: flash attention + output projection -----------------------
    q_spec = pl.BlockSpec((pl.Squeezed(), tq, Dp), lambda b, i, kv: (b, i, 0))
    k_spec = pl.BlockSpec((pl.Squeezed(), tk, Dp), lambda b, i, kv: (b, kv, 0),
                          **kv_kw)
    v_spec = pl.BlockSpec((pl.Squeezed(), tk, Dp), lambda b, i, kv: (b, kv, 0),
                          **kv_kw)
    wo_spec = pl.BlockSpec((Dp, Dp), lambda b, i, kv: (0, 0), **const_kw)
    bo_spec = pl.BlockSpec((1, Dp), lambda b, i, kv: (0, 0), **const_kw)
    o_spec = pl.BlockSpec((pl.Squeezed(), tq, Dp), lambda b, i, kv: (b, i, 0))

    kbuf = max(2, min(kv_buffers, kv_steps))
    flash_est = (2 * tq * Dp * bf16                # q tile, double-buffered
                 + 2 * kbuf * tk * Dp * bf16       # k, v tiles
                 + Dp * Dp * bf16 + Dp * f32       # wo + bo (single buffer)
                 + 2 * tq * Dp * f32               # output tile, double-buffered
                 + tq * Dp * f32 + 2 * tq * f32    # acc / m / l scratch
                 + 4 * tq * tk * f32)              # s / p temporaries

    out_p = pl.pallas_call(
        functools.partial(_flash_attention_kernel, compute_dtype=compute_dtype),
        out_shape=jax.ShapeDtypeStruct((B, S, Dp), out_dtype),
        grid_spec=pltpu.PrefetchScalarGridSpec(
            num_scalar_prefetch=0,
            grid=(B, S // tq, kv_steps),
            in_specs=[q_spec, k_spec, v_spec, wo_spec, bo_spec],
            out_specs=o_spec,
            scratch_shapes=[
                pltpu.VMEM((tq, 1), jnp.float32),    # running max m
                pltpu.VMEM((tq, 1), jnp.float32),    # running denom l
                pltpu.VMEM((tq, Dp), jnp.float32),   # un-normalized context
            ]),
        compiler_params=pltpu.CompilerParams(
            dimension_semantics=("parallel", "parallel", "arbitrary"),
            vmem_limit_bytes=_vmem_limit_bytes(flash_est)),
    )(q, k, v, woc, boc)

    return out_p[..., :D] if Dp != D else out_p


# --------------------------------------------------------------------------
# Pure-JAX reference (mirrors the kernel's precision choices)
# --------------------------------------------------------------------------
def _reference(x, wq, wk, wv, wo, bq, bk, bv, bo, compute_dtype=jnp.bfloat16):
    cdt = compute_dtype
    D = x.shape[-1]
    scale = 1.0 / math.sqrt(D)
    xc = x.astype(cdt)

    def mm2(a, b):  # (..., K) @ (K, N), f32 accumulation
        return jax.lax.dot_general(a.astype(cdt), b.astype(cdt),
                                   (((a.ndim - 1,), (0,)), ((), ())),
                                   preferred_element_type=jnp.float32)

    q = ((mm2(xc, wq) + bq) * scale).astype(cdt)
    k = (mm2(xc, wk) + bk).astype(cdt)
    v = (mm2(xc, wv) + bv).astype(cdt)
    s = jax.lax.dot_general(q, k, (((2,), (2,)), ((0,), (0,))),
                            preferred_element_type=jnp.float32)
    p = jax.nn.softmax(s, axis=-1)
    ctx = jax.lax.dot_general(p.astype(cdt), v, (((2,), (1,)), ((0,), (0,))),
                              preferred_element_type=jnp.float32)
    return mm2(ctx, wo) + bo


# --------------------------------------------------------------------------
# Self-test
# --------------------------------------------------------------------------
if __name__ == "__main__":
    B, S, D = 2, 8, 32

    key = jax.random.PRNGKey(0)
    kx, kq, kk, kv, ko, kbq, kbk, kbv, kbo = jax.random.split(key, 9)

    x = jax.random.normal(kx, (B, S, D), dtype=jnp.float32)

    init = 1.0 / math.sqrt(D)
    wq = jax.random.uniform(kq, (D, D), jnp.float32, -init, init)
    wk = jax.random.uniform(kk, (D, D), jnp.float32, -init, init)
    wv = jax.random.uniform(kv, (D, D), jnp.float32, -init, init)
    wo = jax.random.uniform(ko, (D, D), jnp.float32, -init, init)
    bq = jax.random.uniform(kbq, (1, D), jnp.float32, -init, init)
    bk = jax.random.uniform(kbk, (1, D), jnp.float32, -init, init)
    bv = jax.random.uniform(kbv, (1, D), jnp.float32, -init, init)
    bo = jax.random.uniform(kbo, (1, D), jnp.float32, -init, init)

    try:
        out = attention_layer(x, wq, wk, wv, wo, bq, bk, bv, bo)
        out = jax.block_until_ready(out)
    except Exception:
        # Graceful fallback if custom pipeline_mode (pl.Buffered) specs are
        # not supported by this jax version.
        out = attention_layer(x, wq, wk, wv, wo, bq, bk, bv, bo,
                              use_custom_buffering=False)
        out = jax.block_until_ready(out)

    ref = _reference(x, wq, wk, wv, wo, bq, bk, bv, bo)
    assert out.shape == (B, S, D)
    err = float(jnp.max(jnp.abs(out - ref)))
    assert jnp.allclose(out, ref, atol=2e-2, rtol=2e-2), (
        f"mismatch vs reference: max abs err {err:.3e}")

    print("KERNEL_OK")
</pallas_src>

<mosaic_0001>
module attributes {stable_mosaic.version = 11 : i64} {
  func.func @_qkv_projection_kernel(%arg0: i32, %arg1: i32, %arg2: memref<1x8x128xbf16, #tpu.memory_space<vmem>>, %arg3: memref<128x128xbf16, #tpu.memory_space<vmem>>, %arg4: memref<128x128xbf16, #tpu.memory_space<vmem>>, %arg5: memref<128x128xbf16, #tpu.memory_space<vmem>>, %arg6: memref<1x128xf32, #tpu.memory_space<vmem>>, %arg7: memref<1x128xf32, #tpu.memory_space<vmem>>, %arg8: memref<1x128xf32, #tpu.memory_space<vmem>>, %arg9: memref<1x8x128xbf16, #tpu.memory_space<vmem>>, %arg10: memref<1x8x128xbf16, #tpu.memory_space<vmem>>, %arg11: memref<1x8x128xbf16, #tpu.memory_space<vmem>>) attributes {dimension_semantics = [#tpu.dimension_semantics<parallel>, #tpu.dimension_semantics<parallel>], iteration_bounds = array<i64: 2, 1>, scalar_prefetch = 0 : i64, scratch_operands = 0 : i64, tpu.core_type = #tpu.core_type<tc>, window_params = [{transform_indices = @transform_0, window_bounds = array<i64: 1, 8, 128>}, {pipeline_mode = #tpu.pipeline_mode<synchronous>, transform_indices = @transform_1, window_bounds = array<i64: 128, 128>}, {pipeline_mode = #tpu.pipeline_mode<synchronous>, transform_indices = @transform_2, window_bounds = array<i64: 128, 128>}, {pipeline_mode = #tpu.pipeline_mode<synchronous>, transform_indices = @transform_3, window_bounds = array<i64: 128, 128>}, {pipeline_mode = #tpu.pipeline_mode<synchronous>, transform_indices = @transform_4, window_bounds = array<i64: 1, 128>}, {pipeline_mode = #tpu.pipeline_mode<synchronous>, transform_indices = @transform_5, window_bounds = array<i64: 1, 128>}, {pipeline_mode = #tpu.pipeline_mode<synchronous>, transform_indices = @transform_6, window_bounds = array<i64: 1, 128>}, {transform_indices = @transform_7, window_bounds = array<i64: 1, 8, 128>}, {transform_indices = @transform_8, window_bounds = array<i64: 1, 8, 128>}, {transform_indices = @transform_9, window_bounds = array<i64: 1, 8, 128>}]} {
    %c0 = arith.constant 0 : index
    %c0_0 = arith.constant 0 : index
    %c0_1 = arith.constant 0 : index
    %0 = vector.load %arg2[%c0, %c0_0, %c0_1] : memref<1x8x128xbf16, #tpu.memory_space<vmem>>, vector<1x8x128xbf16>
    %1 = vector.shape_cast %0 : vector<1x8x128xbf16> to vector<8x128xbf16>
    %c0_2 = arith.constant 0 : index
    %c0_3 = arith.constant 0 : index
    %2 = vector.load %arg3[%c0_2, %c0_3] : memref<128x128xbf16, #tpu.memory_space<vmem>>, vector<128x128xbf16>
    %cst = arith.constant dense<0.000000e+00> : vector<8x128xf32>
    %3 = tpu.matmul %1, %2, %cst {dimension_numbers = #tpu.dot_dimension_numbers<[1], [0], [0], [1], [0, 0, 1, 1], [], []>} : vector<8x128xbf16>, vector<128x128xbf16>, vector<8x128xf32> -> vector<8x128xf32>
    %c0_4 = arith.constant 0 : index
    %c0_5 = arith.constant 0 : index
    %4 = vector.load %arg6[%c0_4, %c0_5] : memref<1x128xf32, #tpu.memory_space<vmem>>, vector<1x128xf32>
    %5 = vector.broadcast %4 : vector<1x128xf32> to vector<8x128xf32>
    %6 = arith.addf %3, %5 : vector<8x128xf32>
    %cst_6 = arith.constant 0.176776692 : f32
    %7 = vector.broadcast %cst_6 : f32 to vector<8x128xf32>
    %8 = arith.mulf %6, %7 : vector<8x128xf32>
    %9 = arith.truncf %8 : vector<8x128xf32> to vector<8x128xbf16>
    %c0_7 = arith.constant 0 : index
    %c0_8 = arith.constant 0 : index
    %c0_9 = arith.constant 0 : index
    %10 = vector.load %arg9[%c0_7, %c0_8, %c0_9] : memref<1x8x128xbf16, #tpu.memory_space<vmem>>, vector<1x8x128xbf16>
    %11 = vector.shape_cast %10 : vector<1x8x128xbf16> to vector<8x128xbf16>
    %12 = vector.shape_cast %9 : vector<8x128xbf16> to vector<1x8x128xbf16>
    tpu.vector_store %arg9[%c0_7, %c0_8, %c0_9], %12 {strides = array<i32>} : memref<1x8x128xbf16, #tpu.memory_space<vmem>>, vector<1x8x128xbf16>,
    %c0_10 = arith.constant 0 : index
    %c0_11 = arith.constant 0 : index
    %13 = vector.load %arg4[%c0_10, %c0_11] : memref<128x128xbf16, #tpu.memory_space<vmem>>, vector<128x128xbf16>
    %cst_12 = arith.constant dense<0.000000e+00> : vector<8x128xf32>
    %14 = tpu.matmul %1, %13, %cst_12 {dimension_numbers = #tpu.dot_dimension_numbers<[1], [0], [0], [1], [0, 0, 1, 1], [], []>} : vector<8x128xbf16>, vector<128x128xbf16>, vector<8x128xf32> -> vector<8x128xf32>
    %c0_13 = arith.constant 0 : index
    %c0_14 = arith.constant 0 : index
    %15 = vector.load %arg7[%c0_13, %c0_14] : memref<1x128xf32, #tpu.memory_space<vmem>>, vector<1x128xf32>
    %16 = vector.broadcast %15 : vector<1x128xf32> to vector<8x128xf32>
    %17 = arith.addf %14, %16 : vector<8x128xf32>
    %18 = arith.truncf %17 : vector<8x128xf32> to vector<8x128xbf16>
    %c0_15 = arith.constant 0 : index
    %c0_16 = arith.constant 0 : index
    %c0_17 = arith.constant 0 : index
    %19 = vector.load %arg10[%c0_15, %c0_16, %c0_17] : memref<1x8x128xbf16, #tpu.memory_space<vmem>>, vector<1x8x128xbf16>
    %20 = vector.shape_cast %19 : vector<1x8x128xbf16> to vector<8x128xbf16>
    %21 = vector.shape_cast %18 : vector<8x128xbf16> to vector<1x8x128xbf16>
    tpu.vector_store %arg10[%c0_15, %c0_16, %c0_17], %21 {strides = array<i32>} : memref<1x8x128xbf16, #tpu.memory_space<vmem>>, vector<1x8x128xbf16>,
    %c0_18 = arith.constant 0 : index
    %c0_19 = arith.constant 0 : index
    %22 = vector.load %arg5[%c0_18, %c0_19] : memref<128x128xbf16, #tpu.memory_space<vmem>>, vector<128x128xbf16>
    %cst_20 = arith.constant dense<0.000000e+00> : vector<8x128xf32>
    %23 = tpu.matmul %1, %22, %cst_20 {dimension_numbers = #tpu.dot_dimension_numbers<[1], [0], [0], [1], [0, 0, 1, 1], [], []>} : vector<8x128xbf16>, vector<128x128xbf16>, vector<8x128xf32> -> vector<8x128xf32>
    %c0_21 = arith.constant 0 : index
    %c0_22 = arith.constant 0 : index
    %24 = vector.load %arg8[%c0_21, %c0_22] : memref<1x128xf32, #tpu.memory_space<vmem>>, vector<1x128xf32>
    %25 = vector.broadcast %24 : vector<1x128xf32> to vector<8x128xf32>
    %26 = arith.addf %23, %25 : vector<8x128xf32>
    %27 = arith.truncf %26 : vector<8x128xf32> to vector<8x128xbf16>
    %c0_23 = arith.constant 0 : index
    %c0_24 = arith.constant 0 : index
    %c0_25 = arith.constant 0 : index
    %28 = vector.load %arg11[%c0_23, %c0_24, %c0_25] : memref<1x8x128xbf16, #tpu.memory_space<vmem>>, vector<1x8x128xbf16>
    %29 = vector.shape_cast %28 : vector<1x8x128xbf16> to vector<8x128xbf16>
    %30 = vector.shape_cast %27 : vector<8x128xbf16> to vector<1x8x128xbf16>
    tpu.vector_store %arg11[%c0_23, %c0_24, %c0_25], %30 {strides = array<i32>} : memref<1x8x128xbf16, #tpu.memory_space<vmem>>, vector<1x8x128xbf16>,
    return
  }
  func.func @transform_0(%arg0: i32, %arg1: i32) -> (i32, i32, i32) {
    %c0_i32 = arith.constant 0 : i32
    %c0_i32_0 = arith.constant 0 : i32
    return %arg0, %arg1, %c0_i32 : i32, i32, i32
  }
  func.func @transform_1(%arg0: i32, %arg1: i32) -> (i32, i32) {
    %c0_i32 = arith.constant 0 : i32
    %c0_i32_0 = arith.constant 0 : i32
    %c0_i32_1 = arith.constant 0 : i32
    return %c0_i32, %c0_i32_0 : i32, i32
  }
  func.func @transform_2(%arg0: i32, %arg1: i32) -> (i32, i32) {
    %c0_i32 = arith.constant 0 : i32
    %c0_i32_0 = arith.constant 0 : i32
    %c0_i32_1 = arith.constant 0 : i32
    return %c0_i32, %c0_i32_0 : i32, i32
  }
  func.func @transform_3(%arg0: i32, %arg1: i32) -> (i32, i32) {
    %c0_i32 = arith.constant 0 : i32
    %c0_i32_0 = arith.constant 0 : i32
    %c0_i32_1 = arith.constant 0 : i32
    return %c0_i32, %c0_i32_0 : i32, i32
  }
  func.func @transform_4(%arg0: i32, %arg1: i32) -> (i32, i32) {
    %c0_i32 = arith.constant 0 : i32
    %c0_i32_0 = arith.constant 0 : i32
    %c0_i32_1 = arith.constant 0 : i32
    return %c0_i32, %c0_i32_0 : i32, i32
  }
  func.func @transform_5(%arg0: i32, %arg1: i32) -> (i32, i32) {
    %c0_i32 = arith.constant 0 : i32
    %c0_i32_0 = arith.constant 0 : i32
    %c0_i32_1 = arith.constant 0 : i32
    return %c0_i32, %c0_i32_0 : i32, i32
  }
  func.func @transform_6(%arg0: i32, %arg1: i32) -> (i32, i32) {
    %c0_i32 = arith.constant 0 : i32
    %c0_i32_0 = arith.constant 0 : i32
    %c0_i32_1 = arith.constant 0 : i32
    return %c0_i32, %c0_i32_0 : i32, i32
  }
  func.func @transform_7(%arg0: i32, %arg1: i32) -> (i32, i32, i32) {
    %c0_i32 = arith.constant 0 : i32
    %c0_i32_0 = arith.constant 0 : i32
    return %arg0, %arg1, %c0_i32 : i32, i32, i32
  }
  func.func @transform_8(%arg0: i32, %arg1: i32) -> (i32, i32, i32) {
    %c0_i32 = arith.constant 0 : i32
    %c0_i32_0 = arith.constant 0 : i32
    return %arg0, %arg1, %c0_i32 : i32, i32, i32
  }
  func.func @transform_9(%arg0: i32, %arg1: i32) -> (i32, i32, i32) {
    %c0_i32 = arith.constant 0 : i32
    %c0_i32_0 = arith.constant 0 : i32
    return %arg0, %arg1, %c0_i32 : i32, i32, i32
  }
}

module attributes {stable_mosaic.version = 11 : i64} {
  func.func @_qkv_projection_kernel(%arg0: i32, %arg1: i32, %arg2: memref<1x8x128xbf16, #tpu.memory_space<vmem>>, %arg3: memref<128x128xbf16, #tpu.memory_space<vmem>>, %arg4: memref<128x128xbf16, #tpu.memory_space<vmem>>, %arg5: memref<128x128xbf16, #tpu.memory_space<vmem>>, %arg6: memref<1x128xf32, #tpu.memory_space<vmem>>, %arg7: memref<1x128xf32, #tpu.memory_space<vmem>>, %arg8: memref<1x128xf32, #tpu.memory_space<vmem>>, %arg9: memref<1x8x128xbf16, #tpu.memory_space<vmem>>, %arg10: memref<1x8x128xbf16, #tpu.memory_space<vmem>>, %arg11: memref<1x8x128xbf16, #tpu.memory_space<vmem>>) attributes {dimension_semantics = [#tpu.dimension_semantics<parallel>, #tpu.dimension_semantics<parallel>], iteration_bounds = array<i64: 2, 1>, scalar_prefetch = 0 : i64, scratch_operands = 0 : i64, tpu.core_type = #tpu.core_type<tc>, window_params = [{transform_indices = @transform_0, window_bounds = array<i64: 1, 8, 128>}, {pipeline_mode = #tpu.pipeline_mode<synchronous>, transform_indices = @transform_1, window_bounds = array<i64: 128, 128>}, {pipeline_mode = #tpu.pipeline_mode<synchronous>, transform_indices = @transform_2, window_bounds = array<i64: 128, 128>}, {pipeline_mode = #tpu.pipeline_mode<synchronous>, transform_indices = @transform_3, window_bounds = array<i64: 128, 128>}, {pipeline_mode = #tpu.pipeline_mode<synchronous>, transform_indices = @transform_4, window_bounds = array<i64: 1, 128>}, {pipeline_mode = #tpu.pipeline_mode<synchronous>, transform_indices = @transform_5, window_bounds = array<i64: 1, 128>}, {pipeline_mode = #tpu.pipeline_mode<synchronous>, transform_indices = @transform_6, window_bounds = array<i64: 1, 128>}, {transform_indices = @transform_7, window_bounds = array<i64: 1, 8, 128>}, {transform_indices = @transform_8, window_bounds = array<i64: 1, 8, 128>}, {transform_indices = @transform_9, window_bounds = array<i64: 1, 8, 128>}]} {
    %c0 = arith.constant 0 : index
    %c0_0 = arith.constant 0 : index
    %c0_1 = arith.constant 0 : index
    %0 = vector.load %arg2[%c0, %c0_0, %c0_1] : memref<1x8x128xbf16, #tpu.memory_space<vmem>>, vector<1x8x128xbf16>
    %1 = vector.shape_cast %0 : vector<1x8x128xbf16> to vector<8x128xbf16>
    %c0_2 = arith.constant 0 : index
    %c0_3 = arith.constant 0 : index
    %2 = vector.load %arg3[%c0_2, %c0_3] : memref<128x128xbf16, #tpu.memory_space<vmem>>, vector<128x128xbf16>
    %cst = arith.constant dense<0.000000e+00> : vector<8x128xf32>
    %3 = tpu.matmul %1, %2, %cst {dimension_numbers = #tpu.dot_dimension_numbers<[1], [0], [0], [1], [0, 0, 1, 1], [], []>} : vector<8x128xbf16>, vector<128x128xbf16>, vector<8x128xf32> -> vector<8x128xf32>
    %c0_4 = arith.constant 0 : index
    %c0_5 = arith.constant 0 : index
    %4 = vector.load %arg6[%c0_4, %c0_5] : memref<1x128xf32, #tpu.memory_space<vmem>>, vector<1x128xf32>
    %5 = vector.broadcast %4 : vector<1x128xf32> to vector<8x128xf32>
    %6 = arith.addf %3, %5 : vector<8x128xf32>
    %cst_6 = arith.constant 0.176776692 : f32
    %7 = vector.broadcast %cst_6 : f32 to vector<8x128xf32>
    %8 = arith.mulf %6, %7 : vector<8x128xf32>
    %9 = arith.truncf %8 : vector<8x128xf32> to vector<8x128xbf16>
    %c0_7 = arith.constant 0 : index
    %c0_8 = arith.constant 0 : index
    %c0_9 = arith.constant 0 : index
    %10 = vector.load %arg9[%c0_7, %c0_8, %c0_9] : memref<1x8x128xbf16, #tpu.memory_space<vmem>>, vector<1x8x128xbf16>
    %11 = vector.shape_cast %10 : vector<1x8x128xbf16> to vector<8x128xbf16>
    %12 = vector.shape_cast %9 : vector<8x128xbf16> to vector<1x8x128xbf16>
    tpu.vector_store %arg9[%c0_7, %c0_8, %c0_9], %12 {strides = array<i32>} : memref<1x8x128xbf16, #tpu.memory_space<vmem>>, vector<1x8x128xbf16>,
    %c0_10 = arith.constant 0 : index
    %c0_11 = arith.constant 0 : index
    %13 = vector.load %arg4[%c0_10, %c0_11] : memref<128x128xbf16, #tpu.memory_space<vmem>>, vector<128x128xbf16>
    %cst_12 = arith.constant dense<0.000000e+00> : vector<8x128xf32>
    %14 = tpu.matmul %1, %13, %cst_12 {dimension_numbers = #tpu.dot_dimension_numbers<[1], [0], [0], [1], [0, 0, 1, 1], [], []>} : vector<8x128xbf16>, vector<128x128xbf16>, vector<8x128xf32> -> vector<8x128xf32>
    %c0_13 = arith.constant 0 : index
    %c0_14 = arith.constant 0 : index
    %15 = vector.load %arg7[%c0_13, %c0_14] : memref<1x128xf32, #tpu.memory_space<vmem>>, vector<1x128xf32>
    %16 = vector.broadcast %15 : vector<1x128xf32> to vector<8x128xf32>
    %17 = arith.addf %14, %16 : vector<8x128xf32>
    %18 = arith.truncf %17 : vector<8x128xf32> to vector<8x128xbf16>
    %c0_15 = arith.constant 0 : index
    %c0_16 = arith.constant 0 : index
    %c0_17 = arith.constant 0 : index
    %19 = vector.load %arg10[%c0_15, %c0_16, %c0_17] : memref<1x8x128xbf16, #tpu.memory_space<vmem>>, vector<1x8x128xbf16>
    %20 = vector.shape_cast %19 : vector<1x8x128xbf16> to vector<8x128xbf16>
    %21 = vector.shape_cast %18 : vector<8x128xbf16> to vector<1x8x128xbf16>
    tpu.vector_store %arg10[%c0_15, %c0_16, %c0_17], %21 {strides = array<i32>} : memref<1x8x128xbf16, #tpu.memory_space<vmem>>, vector<1x8x128xbf16>,
    %c0_18 = arith.constant 0 : index
    %c0_19 = arith.constant 0 : index
    %22 = vector.load %arg5[%c0_18, %c0_19] : memref<128x128xbf16, #tpu.memory_space<vmem>>, vector<128x128xbf16>
    %cst_20 = arith.constant dense<0.000000e+00> : vector<8x128xf32>
    %23 = tpu.matmul %1, %22, %cst_20 {dimension_numbers = #tpu.dot_dimension_numbers<[1], [0], [0], [1], [0, 0, 1, 1], [], []>} : vector<8x128xbf16>, vector<128x128xbf16>, vector<8x128xf32> -> vector<8x128xf32>
    %c0_21 = arith.constant 0 : index
    %c0_22 = arith.constant 0 : index
    %24 = vector.load %arg8[%c0_21, %c0_22] : memref<1x128xf32, #tpu.memory_space<vmem>>, vector<1x128xf32>
    %25 = vector.broadcast %24 : vector<1x128xf32> to vector<8x128xf32>
    %26 = arith.addf %23, %25 : vector<8x128xf32>
    %27 = arith.truncf %26 : vector<8x128xf32> to vector<8x128xbf16>
    %c0_23 = arith.constant 0 : index
    %c0_24 = arith.constant 0 : index
    %c0_25 = arith.constant 0 : index
    %28 = vector.load %arg11[%c0_23, %c0_24, %c0_25] : memref<1x8x128xbf16, #tpu.memory_space<vmem>>, vector<1x8x128xbf16>
    %29 = vector.shape_cast %28 : vector<1x8x128xbf16> to vector<8x128xbf16>
    %30 = vector.shape_cast %27 : vector<8x128xbf16> to vector<1x8x128xbf16>
    tpu.vector_store %arg11[%c0_23, %c0_24, %c0_25], %30 {strides = array<i32>} : memref<1x8x128xbf16, #tpu.memory_space<vmem>>, vector<1x8x128xbf16>,
    return
  }
  func.func @transform_0(%arg0: i32, %arg1: i32) -> (i32, i32, i32) {
    %c0_i32 = arith.constant 0 : i32
    %c0_i32_0 = arith.constant 0 : i32
    return %arg0, %arg1, %c0_i32 : i32, i32, i32
  }
  func.func @transform_1(%arg0: i32, %arg1: i32) -> (i32, i32) {
    %c0_i32 = arith.constant 0 : i32
    %c0_i32_0 = arith.constant 0 : i32
    %c0_i32_1 = arith.constant 0 : i32
    return %c0_i32, %c0_i32_0 : i32, i32
  }
  func.func @transform_2(%arg0: i32, %arg1: i32) -> (i32, i32) {
    %c0_i32 = arith.constant 0 : i32
    %c0_i32_0 = arith.constant 0 : i32
    %c0_i32_1 = arith.constant 0 : i32
    return %c0_i32, %c0_i32_0 : i32, i32
  }
  func.func @transform_3(%arg0: i32, %arg1: i32) -> (i32, i32) {
    %c0_i32 = arith.constant 0 : i32
    %c0_i32_0 = arith.constant 0 : i32
    %c0_i32_1 = arith.constant 0 : i32
    return %c0_i32, %c0_i32_0 : i32, i32
  }
  func.func @transform_4(%arg0: i32, %arg1: i32) -> (i32, i32) {
    %c0_i32 = arith.constant 0 : i32
    %c0_i32_0 = arith.constant 0 : i32
    %c0_i32_1 = arith.constant 0 : i32
    return %c0_i32, %c0_i32_0 : i32, i32
  }
  func.func @transform_5(%arg0: i32, %arg1: i32) -> (i32, i32) {
    %c0_i32 = arith.constant 0 : i32
    %c0_i32_0 = arith.constant 0 : i32
    %c0_i32_1 = arith.constant 0 : i32
    return %c0_i32, %c0_i32_0 : i32, i32
  }
  func.func @transform_6(%arg0: i32, %arg1: i32) -> (i32, i32) {
    %c0_i32 = arith.constant 0 : i32
    %c0_i32_0 = arith.constant 0 : i32
    %c0_i32_1 = arith.constant 0 : i32
    return %c0_i32, %c0_i32_0 : i32, i32
  }
  func.func @transform_7(%arg0: i32, %arg1: i32) -> (i32, i32, i32) {
    %c0_i32 = arith.constant 0 : i32
    %c0_i32_0 = arith.constant 0 : i32
    return %arg0, %arg1, %c0_i32 : i32, i32, i32
  }
  func.func @transform_8(%arg0: i32, %arg1: i32) -> (i32, i32, i32) {
    %c0_i32 = arith.constant 0 : i32
    %c0_i32_0 = arith.constant 0 : i32
    return %arg0, %arg1, %c0_i32 : i32, i32, i32
  }
  func.func @transform_9(%arg0: i32, %arg1: i32) -> (i32, i32, i32) {
    %c0_i32 = arith.constant 0 : i32
    %c0_i32_0 = arith.constant 0 : i32
    return %arg0, %arg1, %c0_i32 : i32, i32, i32
  }
}

</mosaic_0001>

<bundles_post_ra>
// kernel: tpu_custom_call.1
= control target key start
LH: loop header
LB: loop body
LE: loop exit
PB: predicated region body
PF: predicated region fallthrough
CT: control target
= control target key end

     0   :  { %s1995_s0 = inlined_call_operand.hbm [shape: bf16[2,8,128], index: 0, kind: input, shape index: {}]   ;;  %s1996_s1 = inlined_call_operand.hbm [shape: bf16[128,128], index: 1, kind: input, shape index: {}]   ;;  %s1997_s2 = inlined_call_operand.hbm [shape: bf16[128,128], index: 2, kind: input, shape index: {}]   ;;  %s1998_s3 = inlined_call_operand.hbm [shape: bf16[128,128], index: 3, kind: input, shape index: {}]   ;;  %s1999_s4 = inlined_call_operand.vmem [shape: f32[1,128], index: 4, kind: input, shape index: {}]   ;;  %s2000_s5 = inlined_call_operand.vmem [shape: f32[1,128], index: 5, kind: input, shape index: {}]   ;;  %s2001_s6 = inlined_call_operand.vmem [shape: f32[1,128], index: 6, kind: input, shape index: {}]   ;;  %s2002_s7 = inlined_call_operand.hbm [shape: bf16[2,8,128], index: 7, kind: output, shape index: {0}]   ;;  %s2003_s8 = inlined_call_operand.hbm [shape: bf16[2,8,128], index: 8, kind: output, shape index: {1}]   ;;  %s2004_s9 = inlined_call_operand.hbm [shape: bf16[2,8,128], index: 9, kind: output, shape index: {2}]  }
   0x1   :  { %2013 = sst [smem:[#allocation21_spill]] %s2001_s6 }
   0x2   :  { %2014 = sst [smem:[#allocation22_spill]] %s2003_s8 }
   0x3   :  { %2015 = sst [smem:[#allocation23_spill]] %s2004_s9 }
   0x4   :  { %15 = vsyncpa [#allocation3], 0 }
   0x5   :  { %17 = vsyncpa [#allocation3 + $0x1], 0 }
   0x6   :  { %18 = vsyncpa [#allocation6], 0 }
   0x7   :  { %19 = vsyncpa [#allocation9], 0 }
   0x8   :  { %20 = vsyncpa [#allocation4], 0 }
   0x9   :  { %22 = vsyncpa [#allocation4 + $0x1], 0 }
   0xa   :  { %23 = vsyncpa [#allocation12], 0 }
   0xb   :  { %25 = vsyncpa [#allocation12 + $0x1], 0  ;;  %s1595_s30 = smov 0   ;;  %s1597_s10 = smov 0  }
   0xc   :  { %s1599_s11 = smov 0   ;;  %s1601_s12 = smov 0  }
   0xd   :  { %s1603_s13 = smov 0   ;;  %s1605_s14 = smov 0  }
   0xe LB: > { %2016 = sst [smem:[#allocation19_spill]] %s1512_s30  ;;  %s1626_s15 = sadd.s32 4294967295, %s1532_s14   ;;  %s1532_s14 = sphi %s1605_s14, %s31_s14   ;;  %s1528_s13 = sphi %s1603_s13, %s2044_s13   ;;  %s1524_s12 = sphi %s1601_s12, %s2043_s12   ;;  %s1520_s11 = sphi %s1599_s11, %s2042_s11   ;;  %s1516_s10 = sphi %s1597_s10, %s2041_s10   ;;  %s1512_s30 = sphi %s1595_s30, %s2040_s30  }
   0xf   : > { %s2005_s16 = sadd.s32 4294967294, %s1532_s14   ;;  %p65_p0 = scmp.ne.s32.totalorder %s1516_s10, %s1512_s30 }
  0x10   : > { %p2007_p1 = scmp.eq.s32.totalorder %s1626_s15, 0  ;;  %p223_p3 = scmp.eq.s32.totalorder %s2005_s16, 1 }
  0x11   : > { %p1000_p5 = scmp.ge.s32.totalorder %s1532_s14, 1  ;;  %p286_p7 = scmp.lt.s32.totalorder %s1532_s14, 3 }
  0x12   : > { %p1637_p4 = por %p2007_p1, %p65_p0  ;;  %p1642_p6 = por %p223_p3, %p65_p0 }
  0x13   : > { %p1647_p8 = pnand %p1000_p5, %p286_p7  ;;  %s1534_s20 = smov [#allocation5]  }
  0x14   : > { %s2017_s17 = scalar_select %p1637_p4, 1, 0 }
  0x15   : > { %s2018_s18 = scalar_select %p1642_p6, 1, 0 }
  0x16   : > { %s2020_s19 = scalar_select %p1647_p8, 1, 0 }
  0x17   : > { %2019 = sst [smem:[#allocation20_spill]] %s2018_s18  ;;  %s298_s21 = sshll.u32 %s1534_s20, 4  ;;  %s1651_s21 = int_to_ptr.vmem [resolvable:$true] %s298_s21 }
  0x18   : > { %p1157_p9 = pneg %p1647_p8  ;;  %s1535_s23 = smov [#allocation7]  }
  0x19   : > { %s311_s24 = sshll.u32 %s1535_s23, 4  ;;  %s1536_s25 = smov [#allocation8]   ;;  %s1662_s24 = int_to_ptr.vmem [resolvable:$true] %s311_s24 }
  0x1a   : > { %p1658_p11 = pnand %p1157_p9, %p2007_p1  ;;  %s1664_s26 = sshll.u32 %s1536_s25, 4  ;;  %s325_s26 = int_to_ptr.vmem [resolvable:$true] %s1664_s26 }
  0x1b   : > { %s1268_s29 = scalar_lea.hbm %s1996_s1, 1024 }
  0x1c   : > { %p1269_p12 = scmp.ne.s32.totalorder %s1996_s1, %s1268_s29  ;;  %p1674_p13 = pneg %p1658_p11 }
  0x1d   : > { %p1275_p5 = scmp.lt.u32.totalorder %s1268_s29, %s1996_s1 }
  0x1e   : > { %p1271_p0 = pnand %p1674_p13, %p1269_p12 }
  0x20   : > { %p1272_p3 = pneg %p1271_p0 }
  0x22   : > { %p1277_p7 = pnand %p1275_p5, %p1272_p3 }
  0x24   : > { %1280 = shalt.err (!%p1277_p7)
}
  0x25   : > { %s1281_s16 = scalar_lea.vmem %s1651_s21, 1024  ;;  %p1289_p2 = scmp.lt.s32.totalorder %s1651_s21, %s1651_s21 }
  0x26   : > { %p1282_p9 = scmp.ne.s32.totalorder %s1651_s21, %s1281_s16  ;;  %p1290_p6 = scmp.lt.s32.totalorder %s1281_s16, %s1281_s16 }
  0x28   : > { %p1284_p10 = pnand %p1282_p9, %p1674_p13  ;;  %p1291_p12 = por %p1290_p6, %p1289_p2 }
  0x2a   : > { %p1285_p1 = pneg %p1284_p10 }
  0x2c   : > { %p1292_p0 = pnand %p1291_p12, %p1285_p1 }
  0x2e   : > { %1295 = shalt.err (!%p1292_p0)
}
  0x2f   : > { %s1537_s27 = smov 64   ;;  %s1538_s28 = smov 4  }
  0x30   : > { %1160 = dma.hbm_to_vmem [thread:$0]  (!%p1658_p11), %s1996_s1, 1024, %s1651_s21, [#allocation6], %s1537_s27, %s1537_s27, %s1538_s28  }
  0x31   : > { %s1296_s16 = scalar_lea.hbm %s1997_s2, 1024 }
  0x32   : > { %p1297_p1 = scmp.ne.s32.totalorder %s1997_s2, %s1296_s16  ;;  %p1303_p10 = scmp.lt.u32.totalorder %s1296_s16, %s1997_s2 }
  0x34   : > { %p1299_p2 = pnand %p1297_p1, %p1674_p13 }
  0x36   : > { %p1300_p6 = pneg %p1299_p2 }
  0x38   : > { %p1305_p3 = pnand %p1303_p10, %p1300_p6 }
  0x3a   : > { %1308 = shalt.err (!%p1305_p3)
}
  0x3b   : > { %s1309_s21 = scalar_lea.vmem %s1662_s24, 1024  ;;  %p1317_p12 = scmp.lt.s32.totalorder %s1662_s24, %s1662_s24 }
  0x3c   : > { %p1310_p5 = scmp.ne.s32.totalorder %s1662_s24, %s1309_s21  ;;  %p1318_p0 = scmp.lt.s32.totalorder %s1309_s21, %s1309_s21 }
  0x3e   : > { %p1312_p7 = pnand %p1310_p5, %p1674_p13  ;;  %p1319_p1 = por %p1318_p0, %p1317_p12 }
  0x40   : > { %p1313_p9 = pneg %p1312_p7 }
  0x42   : > { %p1320_p2 = pnand %p1319_p1, %p1313_p9 }
  0x44   : > { %1323 = shalt.err (!%p1320_p2)
}
  0x45   : > { %1163 = dma.hbm_to_vmem [thread:$0]  (!%p1658_p11), %s1997_s2, 1024, %s1662_s24, [#allocation6], %s1537_s27, %s1537_s27, %s1538_s28  }
  0x46   : > { %s1324_s29 = scalar_lea.hbm %s1998_s3, 1024 }
  0x47   : > { %p1325_p6 = scmp.ne.s32.totalorder %s1998_s3, %s1324_s29  ;;  %p1331_p5 = scmp.lt.u32.totalorder %s1324_s29, %s1998_s3 }
  0x49   : > { %p1327_p10 = pnand %p1325_p6, %p1674_p13 }
  0x4b   : > { %p1328_p3 = pneg %p1327_p10 }
  0x4d   : > { %p1333_p7 = pnand %p1331_p5, %p1328_p3 }
  0x4f   : > { %1336 = shalt.err (!%p1333_p7)
}
  0x50   : > { %s1337_s21 = scalar_lea.vmem %s325_s26, 1024  ;;  %p1345_p1 = scmp.lt.s32.totalorder %s325_s26, %s325_s26 }
  0x51   : > { %p1338_p9 = scmp.ne.s32.totalorder %s325_s26, %s1337_s21  ;;  %p1346_p2 = scmp.lt.s32.totalorder %s1337_s21, %s1337_s21 }
  0x53   : > { %p1340_p12 = pnand %p1338_p9, %p1674_p13  ;;  %p1347_p4 = por %p1346_p2, %p1345_p1 }
  0x55   : > { %p1341_p0 = pneg %p1340_p12 }
  0x57   : > { %p1348_p8 = pnand %p1347_p4, %p1341_p0 }
  0x59   : > { %1351 = shalt.err (!%p1348_p8)
}
  0x5a   : > { %1166 = dma.hbm_to_vmem [thread:$0]  (!%p1658_p11), %s1998_s3, 1024, %s325_s26, [#allocation9], %s1537_s27, %s1537_s27, %s1538_s28  }
  0x5b   : > { %s52_s18 = sadd.s32 1, %s1520_s11  ;;  %s43_s22 = sadd.s32 1, %s1528_s13 }
  0x5c   : > { %p59_p4 = scmp.ne.s32.totalorder %s1520_s11, %s1516_s10  ;;  %p45_p8 = scmp.ge.s32.totalorder %s43_s22, 2 }
  0x5d   : > { %p60_p13 = scmp.eq.s32.totalorder %s1532_s14, 0  ;;  %p2023_p6 = scmp.eq.s32.totalorder %s1626_s15, 1 }
  0x5e   : > { %p1184_p3 = scmp.lt.s32.totalorder %s1532_s14, 2  ;;  %s2046_s22 = smov (%p45_p8, %s43_s22), 0 }
  0x5f   : > { %p1753_p10 = por %p2023_p6, %p59_p4  ;;  %p61_p5 = por %p60_p13, %p59_p4 }
  0x60   : > { %s347_s9 = sand.u32 1, %s1520_s11   ;;  %s47_s30 = ssub.s32 %s1528_s13, %s2046_s22 }
  0x61   : > { %p50_p7 = scmp.eq.s32.totalorder %s47_s30, 0  ;;  %s1005_s26 = sshll.u32 %s347_s9, 2 }
  0x62   : > { %s1006_s27 = sshll.u32 %s1528_s13, 6  ;;  %s351_s25 = scalar_lea.vmem [#allocation2], %s1005_s26 }
  0x63   : > { %s1765_s28 = scalar_select %p50_p7, %s1520_s11, %s52_s18  }
  0x64   : > { %s1770_s23 = scalar_lea.hbm %s1995_s0, %s1006_s27  ;;  %s359_s16 = sshll.u32 %s351_s25, 4  ;;  %s1772_s16 = int_to_ptr.vmem [resolvable:$true] %s359_s16 }
  0x65   : > { %p1776_p11 = pnand %p1184_p3, %p61_p5  ;;  %s348_s24 = scalar_lea.sflag [#allocation3], %s347_s9 }
  0x66   : > { %s1352_s6 = scalar_lea.hbm %s1770_s23, 64  ;;  %s1357_s26 = scalar_lea.hbm %s1995_s0, 128 }
  0x67   : > { %p1353_p9 = scmp.ne.s32.totalorder %s1770_s23, %s1352_s6  ;;  %p1354_p12 = pneg %p1776_p11 }
  0x68   : > { %p1358_p2 = scmp.lt.u32.totalorder %s1770_s23, %s1995_s0  ;;  %p1359_p4 = scmp.lt.u32.totalorder %s1357_s26, %s1352_s6 }
  0x69   : > { %p1355_p0 = pnand %p1354_p12, %p1353_p9  ;;  %p1361_p13 = scmp.lt.u32.totalorder %s1352_s6, %s1770_s23 }
  0x6a   : > { %p1360_p8 = por %p1359_p4, %p1358_p2 }
  0x6b   : > { %p1356_p1 = pneg %p1355_p0 }
  0x6c   : > { %p1362_p6 = por %p1361_p13, %p1360_p8 }
  0x6e   : > { %p1363_p3 = pnand %p1362_p6, %p1356_p1 }
  0x70   : > { %1366 = shalt.err (!%p1363_p3)
}
  0x71   : > { %s1367_s9 = scalar_lea.vmem %s1772_s16, 64  ;;  %s1539_s20 = smov [#allocation2]  }
  0x72   : > { %p1368_p5 = scmp.ne.s32.totalorder %s1772_s16, %s1367_s9  ;;  %s1372_s25 = sshll.u32 %s1539_s20, 4  ;;  %s1373_s25 = int_to_ptr.vmem [resolvable:$false] %s1372_s25 }
  0x73   : > { %s1374_s18 = scalar_lea.vmem %s1373_s25, 128  ;;  %p1375_p0 = scmp.lt.s32.totalorder %s1772_s16, %s1373_s25 }
  0x74   : > { %p1370_p7 = pnand %p1368_p5, %p1354_p12  ;;  %p1376_p2 = scmp.lt.s32.totalorder %s1374_s18, %s1367_s9 }
  0x76   : > { %p1371_p9 = pneg %p1370_p7  ;;  %p1377_p4 = por %p1376_p2, %p1375_p0 }
  0x78   : > { %p1378_p8 = pnand %p1377_p4, %p1371_p9 }
  0x7a   : > { %1381 = shalt.err (!%p1378_p8)
}
  0x7b   : > { %1170 = dma.hbm_to_vmem [thread:$0]  (!%p1776_p11), %s1770_s23, 64, %s1772_s16, %s348_s24  }
  0x7c   : > { %p2026_p1 = scmp.ne.s32.totalorder %s2020_s19, 0 }
  0x7d   : > { %s1808_s6 = sand.u32 (!%p2026_p1), 1, %s1516_s10   ;;  %p2027_p12 = scmp.ne.s32.totalorder (!%p2026_p1), %s2017_s17, 0 }
  0x7e   : > { %368 = sbr.rel (%p2026_p1) target bundleno = 455 (0x1c7), region = 48  ;;  %s1811_s30 = sshll.u32 (!%p2026_p1), %s1808_s6, 2 }
  0x7f   : > { %s371_s26 = scalar_lea.sflag (!%p2026_p1), [#allocation3], %s1808_s6  ;;  %s374_s27 = scalar_lea.vmem (!%p2026_p1), [#allocation2], %s1811_s30 }
  0x85   : > { %1491 = dma.done.wait (%p2027_p12), %s371_s26, 64  }
  0x86   : > { %1493 = vsyncadd (%p2027_p12), %s371_s26, 4294967232  ;;  %p2028_p11 = scmp.eq.s32.totalorder %s1626_s15, 0 }
  0x88   : > { %1495 = dma.done.wait (%p2028_p11), [#allocation6], 2048   ;;  %p2029_p13 = pmov %p2028_p11 }
  0x89   : > { %p2030_p6 = pmov %p2028_p11 }
  0x8a   : > { %1497 = vsyncadd (%p2029_p13), [#allocation6], 4294965248 }
  0x8b   : > { %1499 = dma.done.wait (%p2030_p6), [#allocation9], 1024   ;;  %p2031_p3 = pmov %p2030_p6 }
  0x8c   : > { %v1540_v0 = vmov 0.0   ;;  %vm1541_vm0 = vmmov 0   ;;  %v1244_v1 = vld [vmem:[#allocation5] sm:$0xff]   ;;  %v1245_v2 = vld [vmem:[#allocation5 + $0x8] sm:$0xff]   ;;  %v1246_v3 = vld [vmem:[#allocation5 + $0x10] sm:$0xff]   ;;  %s1863_s23 = sshll.u32 %s1524_s12, 6 }
  0x8d   : > { %1501 = vsyncadd (%p2031_p3), [#allocation9], 4294966272  ;;  %1077 = vmatprep.subr.bf16.mxu0 %v1540_v0  ;;  %1097 = vmatprep.subr.bf16.mxu1 %v1540_v0  ;;  %v1252_v4 = vld [vmem:[#allocation7] sm:$0xff]   ;;  %v1247_v5 = vld [vmem:[#allocation5 + $0x18] sm:$0xff]   ;;  %s416_s16 = scalar_lea.vmem [#allocation10], %s1811_s30  ;;  %s1870_s9 = scalar_lea.hbm %s2002_s7, %s1863_s23 }
  0x8e   : > { %1093 = vmatprep.mubr.msk.bf16.mxu0 %vm1541_vm0, %v1540_v0  ;;  %1113 = vmatprep.mubr.msk.bf16.mxu1 %vm1541_vm0, %v1540_v0  ;;  %v1253_v6 = vld [vmem:[#allocation7 + $0x8] sm:$0xff]   ;;  %v1248_v7 = vld [vmem:[#allocation5 + $0x20] sm:$0xff]   ;;  %v1255_v8 = vld [vmem:[#allocation7 + $0x10] sm:$0xff]   ;;  %s798_s21 = sshll.u32 %s416_s16, 4  ;;  %s778_s12 = sand.u32 1, %s1626_s15   ;;  %s1872_s21 = int_to_ptr.vmem [resolvable:$true] %s798_s21 }
  0x8f   : > { %1078 = vmatpush3.bf16.msra.mxu0 %v1244_v1  ;;  %1098 = vmatpush3.bf16.msra.mxu1 %v1252_v4  ;;  %v1249_v9 = vld [vmem:[#allocation5 + $0x28] sm:$0xff]   ;;  %v1257_v10 = vld [vmem:[#allocation7 + $0x18] sm:$0xff]   ;;  %v1250_v11 = vld [vmem:[#allocation5 + $0x30] sm:$0xff]   ;;  %s423_s18 = scalar_lea.vmem [#allocation11], %s1811_s30  ;;  %s1382_s17 = scalar_lea.vmem %s1872_s21, 64 }
  0x90   : > { %1079 = vmatprep.subr.bf16.mxu0 %v1540_v0  ;;  %1099 = vmatprep.subr.bf16.mxu1 %v1540_v0  ;;  %v1259_v12 = vld [vmem:[#allocation7 + $0x20] sm:$0xff]   ;;  %v1251_v13 = vld [vmem:[#allocation5 + $0x38] sm:$0xff]   ;;  %v1261_v14 = vld [vmem:[#allocation7 + $0x28] sm:$0xff]   ;;  %s1881_s26 = sshll.u32 %s423_s18, 4  ;;  %p1383_p5 = scmp.ne.s32.totalorder %s1872_s21, %s1382_s17  ;;  %s1912_s26 = int_to_ptr.vmem [resolvable:$true] %s1881_s26 }
  0x91   : > { %v432_v15 = vld [vmem:[%s374_s27] sm:$0xf]  ;;  %v1254_v16 = vld [vmem:[#allocation8] sm:$0xff]   ;;  %v1263_v17 = vld [vmem:[#allocation7 + $0x30] sm:$0xff]   ;;  %s774_s27 = scalar_lea.sflag [#allocation4], %s1808_s6  ;;  %s1542_s19 = smov [#allocation10]  }
  0x92   : > { %v1256_v18 = vld [vmem:[#allocation8 + $0x8] sm:$0xff]   ;;  %v1265_v19 = vld [vmem:[#allocation7 + $0x38] sm:$0xff]   ;;  %v1258_v20 = vld [vmem:[#allocation8 + $0x10] sm:$0xff]   ;;  %p1384_p7 = pnand %p1383_p5, %p1753_p10  ;;  %s1386_s24 = sshll.u32 %s1542_s19, 4  ;;  %s1387_s24 = int_to_ptr.vmem [resolvable:$false] %s1386_s24 }
  0x93   : > { %1080 = vmatpush3.bf16.msra.mxu0 %v1245_v2  ;;  %1100 = vmatpush3.bf16.msra.mxu1 %v1253_v6  ;;  %v1260_v21 = vld [vmem:[#allocation8 + $0x18] sm:$0xff]   ;;  %v1262_v22 = vld [vmem:[#allocation8 + $0x20] sm:$0xff]   ;;  %v1264_v23 = vld [vmem:[#allocation8 + $0x28] sm:$0xff]   ;;  %s1388_s29 = scalar_lea.vmem %s1387_s24, 128  ;;  %p1389_p0 = scmp.lt.s32.totalorder %s1872_s21, %s1387_s24 }
  0x94   : > { %1081 = vmatprep.subr.bf16.mxu0 %v1540_v0  ;;  %1101 = vmatprep.subr.bf16.mxu1 %v1540_v0  ;;  %v1266_v24 = vld [vmem:[#allocation8 + $0x30] sm:$0xff]   ;;  %v1267_v25 = vld [vmem:[#allocation8 + $0x38] sm:$0xff]   ;;  %p1385_p9 = pneg %p1384_p7  ;;  %p1390_p2 = scmp.lt.s32.totalorder %s1388_s29, %s1382_s17 }
  0x95   : > { %v1015_v26 = vld [vmem:[%s1999_s4] ss:$0 sm:$0xff] }
  0x96   : > { %v1024_v34 = vld [vmem:[%s2000_s5] ss:$0 sm:$0xff]  ;;  %p1391_p4 = por %p1390_p2, %p1389_p0 }
  0x97   : > { %1082 = vmatpush3.bf16.msra.mxu0 %v1246_v3  ;;  %1102 = vmatpush3.bf16.msra.mxu1 %v1255_v8 }
  0x98   : > { %1083 = vmatprep.subr.bf16.mxu0 %v1540_v0  ;;  %1103 = vmatprep.subr.bf16.mxu1 %v1540_v0  ;;  %p1392_p8 = pnand %p1391_p4, %p1385_p9 }
  0x9b   : > { %1084 = vmatpush3.bf16.msra.mxu0 %v1247_v5  ;;  %1104 = vmatpush3.bf16.msra.mxu1 %v1257_v10 }
  0x9c   : > { %1085 = vmatprep.subr.bf16.mxu0 %v1540_v0  ;;  %1105 = vmatprep.subr.bf16.mxu1 %v1540_v0 }
  0x9f   : > { %1086 = vmatpush3.bf16.msra.mxu0 %v1248_v7  ;;  %1106 = vmatpush3.bf16.msra.mxu1 %v1259_v12 }
  0xa0   : > { %1087 = vmatprep.subr.bf16.mxu0 %v1540_v0  ;;  %1107 = vmatprep.subr.bf16.mxu1 %v1540_v0 }
  0xa3   : > { %1088 = vmatpush3.bf16.msra.mxu0 %v1249_v9  ;;  %1108 = vmatpush3.bf16.msra.mxu1 %v1261_v14 }
  0xa4   : > { %1089 = vmatprep.subr.bf16.mxu0 %v1540_v0  ;;  %1109 = vmatprep.subr.bf16.mxu1 %v1540_v0 }
  0xa7   : > { %1090 = vmatpush3.bf16.msra.mxu0 %v1250_v11  ;;  %1110 = vmatpush3.bf16.msra.mxu1 %v1263_v17 }
  0xa8   : > { %1091 = vmatprep.subr.bf16.mxu0 %v1540_v0  ;;  %1111 = vmatprep.subr.bf16.mxu1 %v1540_v0 }
  0xab   : > { %1092 = vmatpush3.bf16.msra.mxu0 %v1251_v13  ;;  %1112 = vmatpush3.bf16.msra.mxu1 %v1265_v19 }
  0xac   : > { %1117 = vmatprep.subr.bf16.mxu0 %v1540_v0 }
  0xae   : > { %1094 = vmatmul.mubr.bf16.vlgmr.msra.gmra.mrb[0].mxu0 %v432_v15  ;;  %1114 = vmatmul.mubr.bf16.vlgmr.msra.gmra.mrb[0].mxu1 %v432_v15 }
  0xaf   : > { %1118 = vmatpush3.bf16.msra.mxu0 %v1254_v16  ;;  %1133 = vmatprep.mubr.msk.bf16.mxu0 %vm1541_vm0, %v1540_v0 }
  0xb0   : > { %1119 = vmatprep.subr.bf16.mxu0 %v1540_v0 }
  0xb3   : > { %1120 = vmatpush3.bf16.msra.mxu0 %v1256_v18 }
  0xb4   : > { %1121 = vmatprep.subr.bf16.mxu0 %v1540_v0 }
  0xb7   : > { %1122 = vmatpush3.bf16.msra.mxu0 %v1258_v20 }
  0xb8   : > { %1123 = vmatprep.subr.bf16.mxu0 %v1540_v0 }
  0xbb   : > { %1124 = vmatpush3.bf16.msra.mxu0 %v1260_v21 }
  0xbc   : > { %1125 = vmatprep.subr.bf16.mxu0 %v1540_v0 }
  0xbf   : > { %1126 = vmatpush3.bf16.msra.mxu0 %v1262_v22 }
  0xc0   : > { %1127 = vmatprep.subr.bf16.mxu0 %v1540_v0 }
  0xc3   : > { %1128 = vmatpush3.bf16.msra.mxu0 %v1264_v23 }
  0xc4   : > { %1129 = vmatprep.subr.bf16.mxu0 %v1540_v0 }
  0xc7   : > { %1130 = vmatpush3.bf16.msra.mxu0 %v1266_v24 }
  0xc8   : > { %1131 = vmatprep.subr.bf16.mxu0 %v1540_v0 }
  0xcb   : > { %1132 = vmatpush3.bf16.msra.mxu0 %v1267_v25 }
  0xce   : > { %1134 = vmatmul.mubr.bf16.vlgmr.msra.gmra.mrb[4].mxu0 %v432_v15 }
 0x181   : > { %v538_v27 = vpop.f32.mrb[0].mxu0  ;;  %v652_v35 = vpop.f32.mrb[0].mxu1 }
 0x182   : > { %v539_v28 = vadd.f32 %v1015_v26, %v538_v27  ;;  %v1095_v29 = vpop.f32.mrb[1].mxu0 }
 0x183   : > { %v541_v30 = vpop.f32.mrb[2].mxu0 }
 0x184   : > { %v544_v31 = vmul.f32 0.17677669, %v539_v28  ;;  %v1096_v32 = vpop.f32.mrb[3].mxu0 }
 0x186   : > { %v545_v33 = vpack.c.bf16 %v544_v31, %v544_v31 }
 0x188   : > { %546 = vst [vmem:[%s416_s16] sm:$0xf] %v545_v33 }
 0x189   : > { %1395 = shalt.err (!%p1392_p8)
}
 0x18a   : > { %s1396_s6 = scalar_lea.hbm %s1870_s9, 64  ;;  %s1400_s25 = scalar_lea.hbm %s2002_s7, 128 }
 0x18b   : > { %p1397_p1 = scmp.ne.s32.totalorder %s1870_s9, %s1396_s6  ;;  %p1401_p13 = scmp.lt.u32.totalorder %s1870_s9, %s2002_s7 }
 0x18c   : > { %p1402_p6 = scmp.lt.u32.totalorder %s1400_s25, %s1396_s6  ;;  %p1404_p5 = scmp.lt.u32.totalorder %s1396_s6, %s1870_s9 }
 0x18d   : > { %p1398_p12 = pnand %p1397_p1, %p1753_p10 }
 0x18e   : > { %p1403_p3 = por %p1402_p6, %p1401_p13 }
 0x18f   : > { %p1399_p11 = pneg %p1398_p12 }
 0x190   : > { %p1405_p7 = por %p1404_p5, %p1403_p3 }
 0x192   : > { %p1406_p9 = pnand %p1405_p7, %p1399_p11 }
 0x194   : > { %1409 = shalt.err (!%p1406_p9)
}
 0x195   : > { %1151 = dma.vmem_to_hbm [thread:$0]  (%p1753_p10), %s1872_s21, 64, %s1870_s9, %s774_s27   ;;  %v653_v36 = vadd.f32 %v1024_v34, %v652_v35  ;;  %v1115_v37 = vpop.f32.mrb[1].mxu1 }
 0x196   : > { %v655_v38 = vpop.f32.mrb[2].mxu1  ;;  %s2032_s6 = sld [smem:[#allocation22_spill]]  ;;  %s1918_s20 = scalar_lea.sflag [#allocation12], %s778_s12 }
 0x197   : > { %v658_v39 = vpack.c.bf16 %v653_v36, %v653_v36  ;;  %v1116_v40 = vpop.f32.mrb[3].mxu1  ;;  %s1410_s21 = scalar_lea.vmem %s1912_s26, 64  ;;  %s1543_s9 = smov [#allocation11]  }
 0x198   : > { %p1411_p0 = scmp.ne.s32.totalorder %s1912_s26, %s1410_s21  ;;  %s1414_s27 = sshll.u32 %s1543_s9, 4  ;;  %s1415_s27 = int_to_ptr.vmem [resolvable:$false] %s1414_s27 }
 0x199   : > { %659 = vst [vmem:[%s423_s18] sm:$0xf] %v658_v39  ;;  %s1416_s25 = scalar_lea.vmem %s1415_s27, 128  ;;  %p1417_p8 = scmp.lt.s32.totalorder %s1912_s26, %s1415_s27 }
 0x19a   : > { %p1412_p2 = pnand %p1411_p0, %p1753_p10  ;;  %p1418_p1 = scmp.lt.s32.totalorder %s1416_s25, %s1410_s21 }
 0x19c   : > { %s1909_s16 = scalar_lea.hbm %s2032_s6, %s1863_s23  ;;  %p1413_p4 = pneg %p1412_p2 }
 0x19d   : > { %p1419_p12 = por %p1418_p1, %p1417_p8 }
 0x19f   : > { %p1420_p11 = pnand %p1419_p12, %p1413_p4 }
 0x1a1   : > { %1423 = shalt.err (!%p1420_p11)
}
 0x1a2   : > { %s1424_s15 = scalar_lea.hbm %s1909_s16, 64  ;;  %s1428_s19 = scalar_lea.hbm %s2032_s6, 128 }
 0x1a3   : > { %p1425_p13 = scmp.ne.s32.totalorder %s1909_s16, %s1424_s15  ;;  %p1429_p5 = scmp.lt.u32.totalorder %s1909_s16, %s2032_s6 }
 0x1a4   : > { %p1430_p7 = scmp.lt.u32.totalorder %s1428_s19, %s1424_s15  ;;  %p1432_p0 = scmp.lt.u32.totalorder %s1424_s15, %s1909_s16 }
 0x1a5   : > { %p1426_p6 = pnand %p1425_p13, %p1753_p10 }
 0x1a6   : > { %p1431_p9 = por %p1430_p7, %p1429_p5 }
 0x1a7   : > { %p1427_p3 = pneg %p1426_p6 }
 0x1a8   : > { %p1433_p2 = por %p1432_p0, %p1431_p9 }
 0x1aa   : > { %p1434_p4 = pnand %p1433_p2, %p1427_p3 }
 0x1ac   : > { %1437 = shalt.err (!%p1434_p4)
}
 0x1ad   : > { %1152 = dma.vmem_to_hbm [thread:$0]  (%p1753_p10), %s1912_s26, 64, %s1909_s16, %s1918_s20   ;;  %v765_v42 = vpop.f32.mrb[4].mxu0 }
 0x1ae   : > { %s2033_s9 = sld [smem:[#allocation21_spill]]  ;;  %s430_s27 = scalar_lea.vmem [#allocation13], %s1811_s30  ;;  %v1135_v44 = vpop.f32.mrb[5].mxu0 }
 0x1af   : > { %s826_s25 = sshll.u32 %s430_s27, 4  ;;  %v768_v45 = vpop.f32.mrb[6].mxu0  ;;  %s2034_s18 = sld [smem:[#allocation23_spill]]  ;;  %s827_s25 = int_to_ptr.vmem [resolvable:$true] %s826_s25 }
 0x1b0   : > { %v1136_v47 = vpop.f32.mrb[7].mxu0  ;;  %s1438_s26 = scalar_lea.vmem %s827_s25, 64  ;;  %s1544_s16 = smov [#allocation13]  }
 0x1b1   : > { %p1439_p8 = scmp.ne.s32.totalorder %s827_s25, %s1438_s26  ;;  %s1442_s30 = sshll.u32 %s1544_s16, 4  ;;  %s1443_s30 = int_to_ptr.vmem [resolvable:$false] %s1442_s30 }
 0x1b2   : > { %s1444_s24 = scalar_lea.vmem %s1443_s30, 128  ;;  %p1445_p11 = scmp.lt.s32.totalorder %s827_s25, %s1443_s30 }
 0x1b3   : > { %p1440_p1 = pnand %p1439_p8, %p1753_p10  ;;  %p1446_p13 = scmp.lt.s32.totalorder %s1444_s24, %s1438_s26 }
 0x1b4   : > { %v1033_v41 = vld [vmem:[%s2033_s9] ss:$0 sm:$0xff] }
 0x1b5   : > { %v766_v43 = vadd.f32 %v1033_v41, %v765_v42  ;;  %s1950_s19 = scalar_lea.hbm %s2034_s18, %s1863_s23  ;;  %p1441_p12 = pneg %p1440_p1 }
 0x1b6   : > { %p1447_p6 = por %p1446_p13, %p1445_p11 }
 0x1b7   : > { %v771_v46 = vpack.c.bf16 %v766_v43, %v766_v43 }
 0x1b8   : > { %p1448_p3 = pnand %p1447_p6, %p1441_p12 }
 0x1b9   : > { %772 = vst [vmem:[%s430_s27] sm:$0xf] %v771_v46 }
 0x1ba   : > { %1451 = shalt.err (!%p1448_p3)
}
 0x1bb   : > { %s1452_s23 = scalar_lea.hbm %s1950_s19, 64  ;;  %s1456_s21 = scalar_lea.hbm %s2034_s18, 128 }
 0x1bc   : > { %p1453_p5 = scmp.ne.s32.totalorder %s1950_s19, %s1452_s23  ;;  %p1457_p0 = scmp.lt.u32.totalorder %s1950_s19, %s2034_s18 }
 0x1bd   : > { %p1458_p2 = scmp.lt.u32.totalorder %s1456_s21, %s1452_s23  ;;  %p1460_p8 = scmp.lt.u32.totalorder %s1452_s23, %s1950_s19 }
 0x1be   : > { %p1454_p7 = pnand %p1453_p5, %p1753_p10 }
 0x1bf   : > { %p1459_p4 = por %p1458_p2, %p1457_p0 }
 0x1c0   : > { %p1455_p9 = pneg %p1454_p7 }
 0x1c1   : > { %p1461_p1 = por %p1460_p8, %p1459_p4 }
 0x1c3   : > { %p1462_p12 = pnand %p1461_p1, %p1455_p9 }
 0x1c5   : > { %1465 = shalt.err (!%p1462_p12)
}
 0x1c6   : > { %1153 = dma.vmem_to_hbm [thread:$0]  (%p1753_p10), %s827_s25, 64, %s1950_s19, %s1918_s20  }
 0x1c7 PF: > { %s2035_s15 = sld [smem:[#allocation19_spill]]  ;;  %s2036_s12 = sld [smem:[#allocation20_spill]] }
 0x1c8   : > { %p2038_p13 = scmp.ge.s32.totalorder %s1532_s14, 2 }
 0x1cd   : > { %s838_s26 = sand.u32 1, %s2035_s15   ;;  %p2037_p11 = scmp.ne.s32.totalorder %s2036_s12, 0 }
 0x1ce   : > { %s839_s16 = scalar_lea.sflag [#allocation4], %s838_s26 }
 0x1cf   : > { %p1172_p6 = pnand %p2038_p13, %p2037_p11 }
 0x1d1   : > { %1503 = dma.done.wait (!%p1172_p6), %s839_s16, 64  }
 0x1d2   : > { %1505 = vsyncadd (!%p1172_p6), %s839_s16, 4294967232  ;;  %s2039_s30 = sadd.s32 4294967294, %s1532_s14  }
 0x1d3   : > { %s847_s24 = sand.u32 1, %s2039_s30  }
 0x1d4   : > { %s848_s23 = scalar_lea.sflag [#allocation12], %s847_s24 }
 0x1d5   : > { %1507 = dma.done.wait (!%p1172_p6), %s848_s23, 128  }
 0x1d6   : > { %1509 = vsyncadd (!%p1172_p6), %s848_s23, 4294967168  ;;  %s31_s14 = sadd.s32 1, %s1532_s14   ;;  %s2040_s30 = smov %s1516_s10 }
 0x1d7   : > { %p28_p10 = scmp.ge.s32.totalorder %s31_s14, 4   ;;  %s2041_s10 = smov %s1520_s11 }
 0x1d8   : > { %s2042_s11 = smov %s1765_s28  ;;  %s2043_s12 = smov %s1528_s13 }
 0x1d9   : > { %s2044_s13 = smov %s2046_s22  ;;  %30 = sbr.rel (!%p28_p10) target bundleno = 14 (0xe), region = 137 }
 0x1e0   :  { %862 = vsyncpa [#allocation3], 1 }
 0x1e1   :  { %864 = vsyncpa [#allocation3 + $0x1], 1 }
 0x1e2   :  { %865 = vsyncpa [#allocation6], 1 }
 0x1e3   :  { %866 = vsyncpa [#allocation9], 1 }
 0x1e4   :  { %867 = vsyncpa [#allocation4], 1 }
 0x1e5   :  { %869 = vsyncpa [#allocation4 + $0x1], 1 }
 0x1e6   :  { %870 = vsyncpa [#allocation12], 1 }
 0x1e7   :  { %872 = vsyncpa [#allocation12 + $0x1], 1 }

// kernel: tpu_custom_call.1
= control target key start
LH: loop header
LB: loop body
LE: loop exit
PB: predicated region body
PF: predicated region fallthrough
CT: control target
= control target key end

     0   :  { %s1995_s0 = inlined_call_operand.hbm [shape: bf16[2,8,128], index: 0, kind: input, shape index: {}]   ;;  %s1996_s1 = inlined_call_operand.hbm [shape: bf16[128,128], index: 1, kind: input, shape index: {}]   ;;  %s1997_s2 = inlined_call_operand.hbm [shape: bf16[128,128], index: 2, kind: input, shape index: {}]   ;;  %s1998_s3 = inlined_call_operand.hbm [shape: bf16[128,128], index: 3, kind: input, shape index: {}]   ;;  %s1999_s4 = inlined_call_operand.vmem [shape: f32[1,128], index: 4, kind: input, shape index: {}]   ;;  %s2000_s5 = inlined_call_operand.vmem [shape: f32[1,128], index: 5, kind: input, shape index: {}]   ;;  %s2001_s6 = inlined_call_operand.vmem [shape: f32[1,128], index: 6, kind: input, shape index: {}]   ;;  %s2002_s7 = inlined_call_operand.hbm [shape: bf16[2,8,128], index: 7, kind: output, shape index: {0}]   ;;  %s2003_s8 = inlined_call_operand.hbm [shape: bf16[2,8,128], index: 8, kind: output, shape index: {1}]   ;;  %s2004_s9 = inlined_call_operand.hbm [shape: bf16[2,8,128], index: 9, kind: output, shape index: {2}]  }
   0x1   :  { %2013 = sst [smem:[#allocation21_spill]] %s2001_s6 }
   0x2   :  { %2014 = sst [smem:[#allocation22_spill]] %s2003_s8 }
   0x3   :  { %2015 = sst [smem:[#allocation23_spill]] %s2004_s9 }
   0x4   :  { %15 = vsyncpa [#allocation3], 0 }
   0x5   :  { %17 = vsyncpa [#allocation3 + $0x1], 0 }
   0x6   :  { %18 = vsyncpa [#allocation6], 0 }
   0x7   :  { %19 = vsyncpa [#allocation9], 0 }
   0x8   :  { %20 = vsyncpa [#allocation4], 0 }
   0x9   :  { %22 = vsyncpa [#allocation4 + $0x1], 0 }
   0xa   :  { %23 = vsyncpa [#allocation12], 0 }
   0xb   :  { %25 = vsyncpa [#allocation12 + $0x1], 0  ;;  %s1595_s30 = smov 0   ;;  %s1597_s10 = smov 0  }
   0xc   :  { %s1599_s11 = smov 0   ;;  %s1601_s12 = smov 0  }
   0xd   :  { %s1603_s13 = smov 0   ;;  %s1605_s14 = smov 0  }
   0xe LB: > { %2016 = sst [smem:[#allocation19_spill]] %s1512_s30  ;;  %s1626_s15 = sadd.s32 4294967295, %s1532_s14   ;;  %s1532_s14 = sphi %s1605_s14, %s31_s14   ;;  %s1528_s13 = sphi %s1603_s13, %s2044_s13   ;;  %s1524_s12 = sphi %s1601_s12, %s2043_s12   ;;  %s1520_s11 = sphi %s1599_s11, %s2042_s11   ;;  %s1516_s10 = sphi %s1597_s10, %s2041_s10   ;;  %s1512_s30 = sphi %s1595_s30, %s2040_s30  }
   0xf   : > { %s2005_s16 = sadd.s32 4294967294, %s1532_s14   ;;  %p65_p0 = scmp.ne.s32.totalorder %s1516_s10, %s1512_s30 }
  0x10   : > { %p2007_p1 = scmp.eq.s32.totalorder %s1626_s15, 0  ;;  %p223_p3 = scmp.eq.s32.totalorder %s2005_s16, 1 }
  0x11   : > { %p1000_p5 = scmp.ge.s32.totalorder %s1532_s14, 1  ;;  %p286_p7 = scmp.lt.s32.totalorder %s1532_s14, 3 }
  0x12   : > { %p1637_p4 = por %p2007_p1, %p65_p0  ;;  %p1642_p6 = por %p223_p3, %p65_p0 }
  0x13   : > { %p1647_p8 = pnand %p1000_p5, %p286_p7  ;;  %s1534_s20 = smov [#allocation5]  }
  0x14   : > { %s2017_s17 = scalar_select %p1637_p4, 1, 0 }
  0x15   : > { %s2018_s18 = scalar_select %p1642_p6, 1, 0 }
  0x16   : > { %s2020_s19 = scalar_select %p1647_p8, 1, 0 }
  0x17   : > { %2019 = sst [smem:[#allocation20_spill]] %s2018_s18  ;;  %s298_s21 = sshll.u32 %s1534_s20, 4  ;;  %s1651_s21 = int_to_ptr.vmem [resolvable:$true] %s298_s21 }
  0x18   : > { %p1157_p9 = pneg %p1647_p8  ;;  %s1535_s23 = smov [#allocation7]  }
  0x19   : > { %s311_s24 = sshll.u32 %s1535_s23, 4  ;;  %s1536_s25 = smov [#allocation8]   ;;  %s1662_s24 = int_to_ptr.vmem [resolvable:$true] %s311_s24 }
  0x1a   : > { %p1658_p11 = pnand %p1157_p9, %p2007_p1  ;;  %s1664_s26 = sshll.u32 %s1536_s25, 4  ;;  %s325_s26 = int_to_ptr.vmem [resolvable:$true] %s1664_s26 }
  0x1b   : > { %s1268_s29 = scalar_lea.hbm %s1996_s1, 1024 }
  0x1c   : > { %p1269_p12 = scmp.ne.s32.totalorder %s1996_s1, %s1268_s29  ;;  %p1674_p13 = pneg %p1658_p11 }
  0x1d   : > { %p1275_p5 = scmp.lt.u32.totalorder %s1268_s29, %s1996_s1 }
  0x1e   : > { %p1271_p0 = pnand %p1674_p13, %p1269_p12 }
  0x20   : > { %p1272_p3 = pneg %p1271_p0 }
  0x22   : > { %p1277_p7 = pnand %p1275_p5, %p1272_p3 }
  0x24   : > { %1280 = shalt.err (!%p1277_p7)
}
  0x25   : > { %s1281_s16 = scalar_lea.vmem %s1651_s21, 1024  ;;  %p1289_p2 = scmp.lt.s32.totalorder %s1651_s21, %s1651_s21 }
  0x26   : > { %p1282_p9 = scmp.ne.s32.totalorder %s1651_s21, %s1281_s16  ;;  %p1290_p6 = scmp.lt.s32.totalorder %s1281_s16, %s1281_s16 }
  0x28   : > { %p1284_p10 = pnand %p1282_p9, %p1674_p13  ;;  %p1291_p12 = por %p1290_p6, %p1289_p2 }
  0x2a   : > { %p1285_p1 = pneg %p1284_p10 }
  0x2c   : > { %p1292_p0 = pnand %p1291_p12, %p1285_p1 }
  0x2e   : > { %1295 = shalt.err (!%p1292_p0)
}
  0x2f   : > { %s1537_s27 = smov 64   ;;  %s1538_s28 = smov 4  }
  0x30   : > { %1160 = dma.hbm_to_vmem [thread:$0]  (!%p1658_p11), %s1996_s1, 1024, %s1651_s21, [#allocation6], %s1537_s27, %s1537_s27, %s1538_s28  }
  0x31   : > { %s1296_s16 = scalar_lea.hbm %s1997_s2, 1024 }
  0x32   : > { %p1297_p1 = scmp.ne.s32.totalorder %s1997_s2, %s1296_s16  ;;  %p1303_p10 = scmp.lt.u32.totalorder %s1296_s16, %s1997_s2 }
  0x34   : > { %p1299_p2 = pnand %p1297_p1, %p1674_p13 }
  0x36   : > { %p1300_p6 = pneg %p1299_p2 }
  0x38   : > { %p1305_p3 = pnand %p1303_p10, %p1300_p6 }
  0x3a   : > { %1308 = shalt.err (!%p1305_p3)
}
  0x3b   : > { %s1309_s21 = scalar_lea.vmem %s1662_s24, 1024  ;;  %p1317_p12 = scmp.lt.s32.totalorder %s1662_s24, %s1662_s24 }
  0x3c   : > { %p1310_p5 = scmp.ne.s32.totalorder %s1662_s24, %s1309_s21  ;;  %p1318_p0 = scmp.lt.s32.totalorder %s1309_s21, %s1309_s21 }
  0x3e   : > { %p1312_p7 = pnand %p1310_p5, %p1674_p13  ;;  %p1319_p1 = por %p1318_p0, %p1317_p12 }
  0x40   : > { %p1313_p9 = pneg %p1312_p7 }
  0x42   : > { %p1320_p2 = pnand %p1319_p1, %p1313_p9 }
  0x44   : > { %1323 = shalt.err (!%p1320_p2)
}
  0x45   : > { %1163 = dma.hbm_to_vmem [thread:$0]  (!%p1658_p11), %s1997_s2, 1024, %s1662_s24, [#allocation6], %s1537_s27, %s1537_s27, %s1538_s28  }
  0x46   : > { %s1324_s29 = scalar_lea.hbm %s1998_s3, 1024 }
  0x47   : > { %p1325_p6 = scmp.ne.s32.totalorder %s1998_s3, %s1324_s29  ;;  %p1331_p5 = scmp.lt.u32.totalorder %s1324_s29, %s1998_s3 }
  0x49   : > { %p1327_p10 = pnand %p1325_p6, %p1674_p13 }
  0x4b   : > { %p1328_p3 = pneg %p1327_p10 }
  0x4d   : > { %p1333_p7 = pnand %p1331_p5, %p1328_p3 }
  0x4f   : > { %1336 = shalt.err (!%p1333_p7)
}
  0x50   : > { %s1337_s21 = scalar_lea.vmem %s325_s26, 1024  ;;  %p1345_p1 = scmp.lt.s32.totalorder %s325_s26, %s325_s26 }
  0x51   : > { %p1338_p9 = scmp.ne.s32.totalorder %s325_s26, %s1337_s21  ;;  %p1346_p2 = scmp.lt.s32.totalorder %s1337_s21, %s1337_s21 }
  0x53   : > { %p1340_p12 = pnand %p1338_p9, %p1674_p13  ;;  %p1347_p4 = por %p1346_p2, %p1345_p1 }
  0x55   : > { %p1341_p0 = pneg %p1340_p12 }
  0x57   : > { %p1348_p8 = pnand %p1347_p4, %p1341_p0 }
  0x59   : > { %1351 = shalt.err (!%p1348_p8)
}
  0x5a   : > { %1166 = dma.hbm_to_vmem [thread:$0]  (!%p1658_p11), %s1998_s3, 1024, %s325_s26, [#allocation9], %s1537_s27, %s1537_s27, %s1538_s28  }
  0x5b   : > { %s52_s18 = sadd.s32 1, %s1520_s11  ;;  %s43_s22 = sadd.s32 1, %s1528_s13 }
  0x5c   : > { %p59_p4 = scmp.ne.s32.totalorder %s1520_s11, %s1516_s10  ;;  %p45_p8 = scmp.ge.s32.totalorder %s43_s22, 2 }
  0x5d   : > { %p60_p13 = scmp.eq.s32.totalorder %s1532_s14, 0  ;;  %p2023_p6 = scmp.eq.s32.totalorder %s1626_s15, 1 }
  0x5e   : > { %p1184_p3 = scmp.lt.s32.totalorder %s1532_s14, 2  ;;  %s2046_s22 = smov (%p45_p8, %s43_s22), 0 }
  0x5f   : > { %p1753_p10 = por %p2023_p6, %p59_p4  ;;  %p61_p5 = por %p60_p13, %p59_p4 }
  0x60   : > { %s347_s9 = sand.u32 1, %s1520_s11   ;;  %s47_s30 = ssub.s32 %s1528_s13, %s2046_s22 }
  0x61   : > { %p50_p7 = scmp.eq.s32.totalorder %s47_s30, 0  ;;  %s1005_s26 = sshll.u32 %s347_s9, 2 }
  0x62   : > { %s1006_s27 = sshll.u32 %s1528_s13, 6  ;;  %s351_s25 = scalar_lea.vmem [#allocation2], %s1005_s26 }
  0x63   : > { %s1765_s28 = scalar_select %p50_p7, %s1520_s11, %s52_s18  }
  0x64   : > { %s1770_s23 = scalar_lea.hbm %s1995_s0, %s1006_s27  ;;  %s359_s16 = sshll.u32 %s351_s25, 4  ;;  %s1772_s16 = int_to_ptr.vmem [resolvable:$true] %s359_s16 }
  0x65   : > { %p1776_p11 = pnand %p1184_p3, %p61_p5  ;;  %s348_s24 = scalar_lea.sflag [#allocation3], %s347_s9 }
  0x66   : > { %s1352_s6 = scalar_lea.hbm %s1770_s23, 64  ;;  %s1357_s26 = scalar_lea.hbm %s1995_s0, 128 }
  0x67   : > { %p1353_p9 = scmp.ne.s32.totalorder %s1770_s23, %s1352_s6  ;;  %p1354_p12 = pneg %p1776_p11 }
  0x68   : > { %p1358_p2 = scmp.lt.u32.totalorder %s1770_s23, %s1995_s0  ;;  %p1359_p4 = scmp.lt.u32.totalorder %s1357_s26, %s1352_s6 }
  0x69   : > { %p1355_p0 = pnand %p1354_p12, %p1353_p9  ;;  %p1361_p13 = scmp.lt.u32.totalorder %s1352_s6, %s1770_s23 }
  0x6a   : > { %p1360_p8 = por %p1359_p4, %p1358_p2 }
  0x6b   : > { %p1356_p1 = pneg %p1355_p0 }
  0x6c   : > { %p1362_p6 = por %p1361_p13, %p1360_p8 }
  0x6e   : > { %p1363_p3 = pnand %p1362_p6, %p1356_p1 }
  0x70   : > { %1366 = shalt.err (!%p1363_p3)
}
  0x71   : > { %s1367_s9 = scalar_lea.vmem %s1772_s16, 64  ;;  %s1539_s20 = smov [#allocation2]  }
  0x72   : > { %p1368_p5 = scmp.ne.s32.totalorder %s1772_s16, %s1367_s9  ;;  %s1372_s25 = sshll.u32 %s1539_s20, 4  ;;  %s1373_s25 = int_to_ptr.vmem [resolvable:$false] %s1372_s25 }
  0x73   : > { %s1374_s18 = scalar_lea.vmem %s1373_s25, 128  ;;  %p1375_p0 = scmp.lt.s32.totalorder %s1772_s16, %s1373_s25 }
  0x74   : > { %p1370_p7 = pnand %p1368_p5, %p1354_p12  ;;  %p1376_p2 = scmp.lt.s32.totalorder %s1374_s18, %s1367_s9 }
  0x76   : > { %p1371_p9 = pneg %p1370_p7  ;;  %p1377_p4 = por %p1376_p2, %p1375_p0 }
  0x78   : > { %p1378_p8 = pnand %p1377_p4, %p1371_p9 }
  0x7a   : > { %1381 = shalt.err (!%p1378_p8)
}
  0x7b   : > { %1170 = dma.hbm_to_vmem [thread:$0]  (!%p1776_p11), %s1770_s23, 64, %s1772_s16, %s348_s24  }
  0x7c   : > { %p2026_p1 = scmp.ne.s32.totalorder %s2020_s19, 0 }
  0x7d   : > { %s1808_s6 = sand.u32 (!%p2026_p1), 1, %s1516_s10   ;;  %p2027_p12 = scmp.ne.s32.totalorder (!%p2026_p1), %s2017_s17, 0 }
  0x7e   : > { %368 = sbr.rel (%p2026_p1) target bundleno = 455 (0x1c7), region = 48  ;;  %s1811_s30 = sshll.u32 (!%p2026_p1), %s1808_s6, 2 }
  0x7f   : > { %s371_s26 = scalar_lea.sflag (!%p2026_p1), [#allocation3], %s1808_s6  ;;  %s374_s27 = scalar_lea.vmem (!%p2026_p1), [#allocation2], %s1811_s30 }
  0x85   : > { %1491 = dma.done.wait (%p2027_p12), %s371_s26, 64  }
  0x86   : > { %1493 = vsyncadd (%p2027_p12), %s371_s26, 4294967232  ;;  %p2028_p11 = scmp.eq.s32.totalorder %s1626_s15, 0 }
  0x88   : > { %1495 = dma.done.wait (%p2028_p11), [#allocation6], 2048   ;;  %p2029_p13 = pmov %p2028_p11 }
  0x89   : > { %p2030_p6 = pmov %p2028_p11 }
  0x8a   : > { %1497 = vsyncadd (%p2029_p13), [#allocation6], 4294965248 }
  0x8b   : > { %1499 = dma.done.wait (%p2030_p6), [#allocation9], 1024   ;;  %p2031_p3 = pmov %p2030_p6 }
  0x8c   : > { %v1540_v0 = vmov 0.0   ;;  %vm1541_vm0 = vmmov 0   ;;  %v1244_v1 = vld [vmem:[#allocation5] sm:$0xff]   ;;  %v1245_v2 = vld [vmem:[#allocation5 + $0x8] sm:$0xff]   ;;  %v1246_v3 = vld [vmem:[#allocation5 + $0x10] sm:$0xff]   ;;  %s1863_s23 = sshll.u32 %s1524_s12, 6 }
  0x8d   : > { %1501 = vsyncadd (%p2031_p3), [#allocation9], 4294966272  ;;  %1077 = vmatprep.subr.bf16.mxu0 %v1540_v0  ;;  %1097 = vmatprep.subr.bf16.mxu1 %v1540_v0  ;;  %v1252_v4 = vld [vmem:[#allocation7] sm:$0xff]   ;;  %v1247_v5 = vld [vmem:[#allocation5 + $0x18] sm:$0xff]   ;;  %s416_s16 = scalar_lea.vmem [#allocation10], %s1811_s30  ;;  %s1870_s9 = scalar_lea.hbm %s2002_s7, %s1863_s23 }
  0x8e   : > { %1093 = vmatprep.mubr.msk.bf16.mxu0 %vm1541_vm0, %v1540_v0  ;;  %1113 = vmatprep.mubr.msk.bf16.mxu1 %vm1541_vm0, %v1540_v0  ;;  %v1253_v6 = vld [vmem:[#allocation7 + $0x8] sm:$0xff]   ;;  %v1248_v7 = vld [vmem:[#allocation5 + $0x20] sm:$0xff]   ;;  %v1255_v8 = vld [vmem:[#allocation7 + $0x10] sm:$0xff]   ;;  %s798_s21 = sshll.u32 %s416_s16, 4  ;;  %s778_s12 = sand.u32 1, %s1626_s15   ;;  %s1872_s21 = int_to_ptr.vmem [resolvable:$true] %s798_s21 }
  0x8f   : > { %1078 = vmatpush3.bf16.msra.mxu0 %v1244_v1  ;;  %1098 = vmatpush3.bf16.msra.mxu1 %v1252_v4  ;;  %v1249_v9 = vld [vmem:[#allocation5 + $0x28] sm:$0xff]   ;;  %v1257_v10 = vld [vmem:[#allocation7 + $0x18] sm:$0xff]   ;;  %v1250_v11 = vld [vmem:[#allocation5 + $0x30] sm:$0xff]   ;;  %s423_s18 = scalar_lea.vmem [#allocation11], %s1811_s30  ;;  %s1382_s17 = scalar_lea.vmem %s1872_s21, 64 }
  0x90   : > { %1079 = vmatprep.subr.bf16.mxu0 %v1540_v0  ;;  %1099 = vmatprep.subr.bf16.mxu1 %v1540_v0  ;;  %v1259_v12 = vld [vmem:[#allocation7 + $0x20] sm:$0xff]   ;;  %v1251_v13 = vld [vmem:[#allocation5 + $0x38] sm:$0xff]   ;;  %v1261_v14 = vld [vmem:[#allocation7 + $0x28] sm:$0xff]   ;;  %s1881_s26 = sshll.u32 %s423_s18, 4  ;;  %p1383_p5 = scmp.ne.s32.totalorder %s1872_s21, %s1382_s17  ;;  %s1912_s26 = int_to_ptr.vmem [resolvable:$true] %s1881_s26 }
  0x91   : > { %v432_v15 = vld [vmem:[%s374_s27] sm:$0xf]  ;;  %v1254_v16 = vld [vmem:[#allocation8] sm:$0xff]   ;;  %v1263_v17 = vld [vmem:[#allocation7 + $0x30] sm:$0xff]   ;;  %s774_s27 = scalar_lea.sflag [#allocation4], %s1808_s6  ;;  %s1542_s19 = smov [#allocation10]  }
  0x92   : > { %v1256_v18 = vld [vmem:[#allocation8 + $0x8] sm:$0xff]   ;;  %v1265_v19 = vld [vmem:[#allocation7 + $0x38] sm:$0xff]   ;;  %v1258_v20 = vld [vmem:[#allocation8 + $0x10] sm:$0xff]   ;;  %p1384_p7 = pnand %p1383_p5, %p1753_p10  ;;  %s1386_s24 = sshll.u32 %s1542_s19, 4  ;;  %s1387_s24 = int_to_ptr.vmem [resolvable:$false] %s1386_s24 }
  0x93   : > { %1080 = vmatpush3.bf16.msra.mxu0 %v1245_v2  ;;  %1100 = vmatpush3.bf16.msra.mxu1 %v1253_v6  ;;  %v1260_v21 = vld [vmem:[#allocation8 + $0x18] sm:$0xff]   ;;  %v1262_v22 = vld [vmem:[#allocation8 + $0x20] sm:$0xff]   ;;  %v1264_v23 = vld [vmem:[#allocation8 + $0x28] sm:$0xff]   ;;  %s1388_s29 = scalar_lea.vmem %s1387_s24, 128  ;;  %p1389_p0 = scmp.lt.s32.totalorder %s1872_s21, %s1387_s24 }
  0x94   : > { %1081 = vmatprep.subr.bf16.mxu0 %v1540_v0  ;;  %1101 = vmatprep.subr.bf16.mxu1 %v1540_v0  ;;  %v1266_v24 = vld [vmem:[#allocation8 + $0x30] sm:$0xff]   ;;  %v1267_v25 = vld [vmem:[#allocation8 + $0x38] sm:$0xff]   ;;  %p1385_p9 = pneg %p1384_p7  ;;  %p1390_p2 = scmp.lt.s32.totalorder %s1388_s29, %s1382_s17 }
  0x95   : > { %v1015_v26 = vld [vmem:[%s1999_s4] ss:$0 sm:$0xff] }
  0x96   : > { %v1024_v34 = vld [vmem:[%s2000_s5] ss:$0 sm:$0xff]  ;;  %p1391_p4 = por %p1390_p2, %p1389_p0 }
  0x97   : > { %1082 = vmatpush3.bf16.msra.mxu0 %v1246_v3  ;;  %1102 = vmatpush3.bf16.msra.mxu1 %v1255_v8 }
  0x98   : > { %1083 = vmatprep.subr.bf16.mxu0 %v1540_v0  ;;  %1103 = vmatprep.subr.bf16.mxu1 %v1540_v0  ;;  %p1392_p8 = pnand %p1391_p4, %p1385_p9 }
  0x9b   : > { %1084 = vmatpush3.bf16.msra.mxu0 %v1247_v5  ;;  %1104 = vmatpush3.bf16.msra.mxu1 %v1257_v10 }
  0x9c   : > { %1085 = vmatprep.subr.bf16.mxu0 %v1540_v0  ;;  %1105 = vmatprep.subr.bf16.mxu1 %v1540_v0 }
  0x9f   : > { %1086 = vmatpush3.bf16.msra.mxu0 %v1248_v7  ;;  %1106 = vmatpush3.bf16.msra.mxu1 %v1259_v12 }
  0xa0   : > { %1087 = vmatprep.subr.bf16.mxu0 %v1540_v0  ;;  %1107 = vmatprep.subr.bf16.mxu1 %v1540_v0 }
  0xa3   : > { %1088 = vmatpush3.bf16.msra.mxu0 %v1249_v9  ;;  %1108 = vmatpush3.bf16.msra.mxu1 %v1261_v14 }
  0xa4   : > { %1089 = vmatprep.subr.bf16.mxu0 %v1540_v0  ;;  %1109 = vmatprep.subr.bf16.mxu1 %v1540_v0 }
  0xa7   : > { %1090 = vmatpush3.bf16.msra.mxu0 %v1250_v11  ;;  %1110 = vmatpush3.bf16.msra.mxu1 %v1263_v17 }
  0xa8   : > { %1091 = vmatprep.subr.bf16.mxu0 %v1540_v0  ;;  %1111 = vmatprep.subr.bf16.mxu1 %v1540_v0 }
  0xab   : > { %1092 = vmatpush3.bf16.msra.mxu0 %v1251_v13  ;;  %1112 = vmatpush3.bf16.msra.mxu1 %v1265_v19 }
  0xac   : > { %1117 = vmatprep.subr.bf16.mxu0 %v1540_v0 }
  0xae   : > { %1094 = vmatmul.mubr.bf16.vlgmr.msra.gmra.mrb[0].mxu0 %v432_v15  ;;  %1114 = vmatmul.mubr.bf16.vlgmr.msra.gmra.mrb[0].mxu1 %v432_v15 }
  0xaf   : > { %1118 = vmatpush3.bf16.msra.mxu0 %v1254_v16  ;;  %1133 = vmatprep.mubr.msk.bf16.mxu0 %vm1541_vm0, %v1540_v0 }
  0xb0   : > { %1119 = vmatprep.subr.bf16.mxu0 %v1540_v0 }
  0xb3   : > { %1120 = vmatpush3.bf16.msra.mxu0 %v1256_v18 }
  0xb4   : > { %1121 = vmatprep.subr.bf16.mxu0 %v1540_v0 }
  0xb7   : > { %1122 = vmatpush3.bf16.msra.mxu0 %v1258_v20 }
  0xb8   : > { %1123 = vmatprep.subr.bf16.mxu0 %v1540_v0 }
  0xbb   : > { %1124 = vmatpush3.bf16.msra.mxu0 %v1260_v21 }
  0xbc   : > { %1125 = vmatprep.subr.bf16.mxu0 %v1540_v0 }
  0xbf   : > { %1126 = vmatpush3.bf16.msra.mxu0 %v1262_v22 }
  0xc0   : > { %1127 = vmatprep.subr.bf16.mxu0 %v1540_v0 }
  0xc3   : > { %1128 = vmatpush3.bf16.msra.mxu0 %v1264_v23 }
  0xc4   : > { %1129 = vmatprep.subr.bf16.mxu0 %v1540_v0 }
  0xc7   : > { %1130 = vmatpush3.bf16.msra.mxu0 %v1266_v24 }
  0xc8   : > { %1131 = vmatprep.subr.bf16.mxu0 %v1540_v0 }
  0xcb   : > { %1132 = vmatpush3.bf16.msra.mxu0 %v1267_v25 }
  0xce   : > { %1134 = vmatmul.mubr.bf16.vlgmr.msra.gmra.mrb[4].mxu0 %v432_v15 }
 0x181   : > { %v538_v27 = vpop.f32.mrb[0].mxu0  ;;  %v652_v35 = vpop.f32.mrb[0].mxu1 }
 0x182   : > { %v539_v28 = vadd.f32 %v1015_v26, %v538_v27  ;;  %v1095_v29 = vpop.f32.mrb[1].mxu0 }
 0x183   : > { %v541_v30 = vpop.f32.mrb[2].mxu0 }
 0x184   : > { %v544_v31 = vmul.f32 0.17677669, %v539_v28  ;;  %v1096_v32 = vpop.f32.mrb[3].mxu0 }
 0x186   : > { %v545_v33 = vpack.c.bf16 %v544_v31, %v544_v31 }
 0x188   : > { %546 = vst [vmem:[%s416_s16] sm:$0xf] %v545_v33 }
 0x189   : > { %1395 = shalt.err (!%p1392_p8)
}
 0x18a   : > { %s1396_s6 = scalar_lea.hbm %s1870_s9, 64  ;;  %s1400_s25 = scalar_lea.hbm %s2002_s7, 128 }
 0x18b   : > { %p1397_p1 = scmp.ne.s32.totalorder %s1870_s9, %s1396_s6  ;;  %p1401_p13 = scmp.lt.u32.totalorder %s1870_s9, %s2002_s7 }
 0x18c   : > { %p1402_p6 = scmp.lt.u32.totalorder %s1400_s25, %s1396_s6  ;;  %p1404_p5 = scmp.lt.u32.totalorder %s1396_s6, %s1870_s9 }
 0x18d   : > { %p1398_p12 = pnand %p1397_p1, %p1753_p10 }
 0x18e   : > { %p1403_p3 = por %p1402_p6, %p1401_p13 }
 0x18f   : > { %p1399_p11 = pneg %p1398_p12 }
 0x190   : > { %p1405_p7 = por %p1404_p5, %p1403_p3 }
 0x192   : > { %p1406_p9 = pnand %p1405_p7, %p1399_p11 }
 0x194   : > { %1409 = shalt.err (!%p1406_p9)
}
 0x195   : > { %1151 = dma.vmem_to_hbm [thread:$0]  (%p1753_p10), %s1872_s21, 64, %s1870_s9, %s774_s27   ;;  %v653_v36 = vadd.f32 %v1024_v34, %v652_v35  ;;  %v1115_v37 = vpop.f32.mrb[1].mxu1 }
 0x196   : > { %v655_v38 = vpop.f32.mrb[2].mxu1  ;;  %s2032_s6 = sld [smem:[#allocation22_spill]]  ;;  %s1918_s20 = scalar_lea.sflag [#allocation12], %s778_s12 }
 0x197   : > { %v658_v39 = vpack.c.bf16 %v653_v36, %v653_v36  ;;  %v1116_v40 = vpop.f32.mrb[3].mxu1  ;;  %s1410_s21 = scalar_lea.vmem %s1912_s26, 64  ;;  %s1543_s9 = smov [#allocation11]  }
 0x198   : > { %p1411_p0 = scmp.ne.s32.totalorder %s1912_s26, %s1410_s21  ;;  %s1414_s27 = sshll.u32 %s1543_s9, 4  ;;  %s1415_s27 = int_to_ptr.vmem [resolvable:$false] %s1414_s27 }
 0x199   : > { %659 = vst [vmem:[%s423_s18] sm:$0xf] %v658_v39  ;;  %s1416_s25 = scalar_lea.vmem %s1415_s27, 128  ;;  %p1417_p8 = scmp.lt.s32.totalorder %s1912_s26, %s1415_s27 }
 0x19a   : > { %p1412_p2 = pnand %p1411_p0, %p1753_p10  ;;  %p1418_p1 = scmp.lt.s32.totalorder %s1416_s25, %s1410_s21 }
 0x19c   : > { %s1909_s16 = scalar_lea.hbm %s2032_s6, %s1863_s23  ;;  %p1413_p4 = pneg %p1412_p2 }
 0x19d   : > { %p1419_p12 = por %p1418_p1, %p1417_p8 }
 0x19f   : > { %p1420_p11 = pnand %p1419_p12, %p1413_p4 }
 0x1a1   : > { %1423 = shalt.err (!%p1420_p11)
}
 0x1a2   : > { %s1424_s15 = scalar_lea.hbm %s1909_s16, 64  ;;  %s1428_s19 = scalar_lea.hbm %s2032_s6, 128 }
 0x1a3   : > { %p1425_p13 = scmp.ne.s32.totalorder %s1909_s16, %s1424_s15  ;;  %p1429_p5 = scmp.lt.u32.totalorder %s1909_s16, %s2032_s6 }
 0x1a4   : > { %p1430_p7 = scmp.lt.u32.totalorder %s1428_s19, %s1424_s15  ;;  %p1432_p0 = scmp.lt.u32.totalorder %s1424_s15, %s1909_s16 }
 0x1a5   : > { %p1426_p6 = pnand %p1425_p13, %p1753_p10 }
 0x1a6   : > { %p1431_p9 = por %p1430_p7, %p1429_p5 }
 0x1a7   : > { %p1427_p3 = pneg %p1426_p6 }
 0x1a8   : > { %p1433_p2 = por %p1432_p0, %p1431_p9 }
 0x1aa   : > { %p1434_p4 = pnand %p1433_p2, %p1427_p3 }
 0x1ac   : > { %1437 = shalt.err (!%p1434_p4)
}
 0x1ad   : > { %1152 = dma.vmem_to_hbm [thread:$0]  (%p1753_p10), %s1912_s26, 64, %s1909_s16, %s1918_s20   ;;  %v765_v42 = vpop.f32.mrb[4].mxu0 }
 0x1ae   : > { %s2033_s9 = sld [smem:[#allocation21_spill]]  ;;  %s430_s27 = scalar_lea.vmem [#allocation13], %s1811_s30  ;;  %v1135_v44 = vpop.f32.mrb[5].mxu0 }
 0x1af   : > { %s826_s25 = sshll.u32 %s430_s27, 4  ;;  %v768_v45 = vpop.f32.mrb[6].mxu0  ;;  %s2034_s18 = sld [smem:[#allocation23_spill]]  ;;  %s827_s25 = int_to_ptr.vmem [resolvable:$true] %s826_s25 }
 0x1b0   : > { %v1136_v47 = vpop.f32.mrb[7].mxu0  ;;  %s1438_s26 = scalar_lea.vmem %s827_s25, 64  ;;  %s1544_s16 = smov [#allocation13]  }
 0x1b1   : > { %p1439_p8 = scmp.ne.s32.totalorder %s827_s25, %s1438_s26  ;;  %s1442_s30 = sshll.u32 %s1544_s16, 4  ;;  %s1443_s30 = int_to_ptr.vmem [resolvable:$false] %s1442_s30 }
 0x1b2   : > { %s1444_s24 = scalar_lea.vmem %s1443_s30, 128  ;;  %p1445_p11 = scmp.lt.s32.totalorder %s827_s25, %s1443_s30 }
 0x1b3   : > { %p1440_p1 = pnand %p1439_p8, %p1753_p10  ;;  %p1446_p13 = scmp.lt.s32.totalorder %s1444_s24, %s1438_s26 }
 0x1b4   : > { %v1033_v41 = vld [vmem:[%s2033_s9] ss:$0 sm:$0xff] }
 0x1b5   : > { %v766_v43 = vadd.f32 %v1033_v41, %v765_v42  ;;  %s1950_s19 = scalar_lea.hbm %s2034_s18, %s1863_s23  ;;  %p1441_p12 = pneg %p1440_p1 }
 0x1b6   : > { %p1447_p6 = por %p1446_p13, %p1445_p11 }
 0x1b7   : > { %v771_v46 = vpack.c.bf16 %v766_v43, %v766_v43 }
 0x1b8   : > { %p1448_p3 = pnand %p1447_p6, %p1441_p12 }
 0x1b9   : > { %772 = vst [vmem:[%s430_s27] sm:$0xf] %v771_v46 }
 0x1ba   : > { %1451 = shalt.err (!%p1448_p3)
}
 0x1bb   : > { %s1452_s23 = scalar_lea.hbm %s1950_s19, 64  ;;  %s1456_s21 = scalar_lea.hbm %s2034_s18, 128 }
 0x1bc   : > { %p1453_p5 = scmp.ne.s32.totalorder %s1950_s19, %s1452_s23  ;;  %p1457_p0 = scmp.lt.u32.totalorder %s1950_s19, %s2034_s18 }
 0x1bd   : > { %p1458_p2 = scmp.lt.u32.totalorder %s1456_s21, %s1452_s23  ;;  %p1460_p8 = scmp.lt.u32.totalorder %s1452_s23, %s1950_s19 }
 0x1be   : > { %p1454_p7 = pnand %p1453_p5, %p1753_p10 }
 0x1bf   : > { %p1459_p4 = por %p1458_p2, %p1457_p0 }
 0x1c0   : > { %p1455_p9 = pneg %p1454_p7 }
 0x1c1   : > { %p1461_p1 = por %p1460_p8, %p1459_p4 }
 0x1c3   : > { %p1462_p12 = pnand %p1461_p1, %p1455_p9 }
 0x1c5   : > { %1465 = shalt.err (!%p1462_p12)
}
 0x1c6   : > { %1153 = dma.vmem_to_hbm [thread:$0]  (%p1753_p10), %s827_s25, 64, %s1950_s19, %s1918_s20  }
 0x1c7 PF: > { %s2035_s15 = sld [smem:[#allocation19_spill]]  ;;  %s2036_s12 = sld [smem:[#allocation20_spill]] }
 0x1c8   : > { %p2038_p13 = scmp.ge.s32.totalorder %s1532_s14, 2 }
 0x1cd   : > { %s838_s26 = sand.u32 1, %s2035_s15   ;;  %p2037_p11 = scmp.ne.s32.totalorder %s2036_s12, 0 }
 0x1ce   : > { %s839_s16 = scalar_lea.sflag [#allocation4], %s838_s26 }
 0x1cf   : > { %p1172_p6 = pnand %p2038_p13, %p2037_p11 }
 0x1d1   : > { %1503 = dma.done.wait (!%p1172_p6), %s839_s16, 64  }
 0x1d2   : > { %1505 = vsyncadd (!%p1172_p6), %s839_s16, 4294967232  ;;  %s2039_s30 = sadd.s32 4294967294, %s1532_s14  }
 0x1d3   : > { %s847_s24 = sand.u32 1, %s2039_s30  }
 0x1d4   : > { %s848_s23 = scalar_lea.sflag [#allocation12], %s847_s24 }
 0x1d5   : > { %1507 = dma.done.wait (!%p1172_p6), %s848_s23, 128  }
 0x1d6   : > { %1509 = vsyncadd (!%p1172_p6), %s848_s23, 4294967168  ;;  %s31_s14 = sadd.s32 1, %s1532_s14   ;;  %s2040_s30 = smov %s1516_s10 }
 0x1d7   : > { %p28_p10 = scmp.ge.s32.totalorder %s31_s14, 4   ;;  %s2041_s10 = smov %s1520_s11 }
 0x1d8   : > { %s2042_s11 = smov %s1765_s28  ;;  %s2043_s12 = smov %s1528_s13 }
 0x1d9   : > { %s2044_s13 = smov %s2046_s22  ;;  %30 = sbr.rel (!%p28_p10) target bundleno = 14 (0xe), region = 137 }
 0x1e0   :  { %862 = vsyncpa [#allocation3], 1 }
 0x1e1   :  { %864 = vsyncpa [#allocation3 + $0x1], 1 }
 0x1e2   :  { %865 = vsyncpa [#allocation6], 1 }
 0x1e3   :  { %866 = vsyncpa [#allocation9], 1 }
 0x1e4   :  { %867 = vsyncpa [#allocation4], 1 }
 0x1e5   :  { %869 = vsyncpa [#allocation4 + $0x1], 1 }
 0x1e6   :  { %870 = vsyncpa [#allocation12], 1 }
 0x1e7   :  { %872 = vsyncpa [#allocation12 + $0x1], 1 }

</bundles_post_ra>
